<compile_context>
chip_gen: v7x
topology: tpu7x:2x2x1
jax: 0.10.0
libtpu: 0.0.40
codegen_flags: <defaults>
</compile_context>

<pallas_src>
import functools

import jax
import jax.numpy as jnp
from jax import lax
from jax.experimental import pallas as pl
from jax.experimental.pallas import tpu as pltpu

# ---------------- model config (tiny, deterministic) ----------------
VOCAB = 100        # vocab size
MAX_POS = 16       # max position embeddings
D = 32             # hidden size
H = 2              # attention heads
DH = D // H        # head dim
FFN = 64           # intermediate size
LAYERS = 2         # encoder layers
NUM_LABELS = 3     # dim_output
PAD_N = 128        # lane-dense padded width for logits/probs
EPS = 1e-12        # BERT LayerNorm eps
NEG_MASK = -1e9    # additive attention-mask value (HF-style)
NEG_PAD = -1e30    # classifier-bias padding -> exp underflows to exactly 0

# packed-slab row layout
WSLAB_ROWS = 2 * D + FFN          # 128 : [0:D]=wqkv|wo, [D:2D]=w1, [2D:2D+FFN]=w2
BSLAB_ROWS = 8                    # row0=bqkv|bo, row1=ln1g|ln1b|b1, row2=b2|ln2g|ln2b
ROW_POOLW = MAX_POS               # 16..48  pooler_w
ROW_CLSW = MAX_POS + D            # 48..80  cls_w (padded to 128 lanes)
ROW_VEC = MAX_POS + 2 * D         # 80      emb_ln_g | emb_ln_b | pooler_b
ROW_CLSB = ROW_VEC + 1            # 81      cls_b (padded with NEG_PAD)
HSLAB_ROWS = 88                   # padded to a multiple of 8


# ---------------- in-kernel helpers ----------------
def _ln(x, g, b):
    mu = jnp.mean(x, axis=-1, keepdims=True)
    var = jnp.mean((x - mu) ** 2, axis=-1, keepdims=True)
    return (x - mu) * lax.rsqrt(var + EPS) * g + b


# ---------------- per-sequence fused kernel (one grid step = one sequence) ---
def _seq_kernel(S, ids_ref, bias_ref, tok_ref, w_ref, b_ref, h_ref, o_ref):
    f32 = jnp.float32
    bf16 = jnp.bfloat16

    # ---- embeddings ----
    # TODO(synk): one-hot matmul gather is toy-vocab only; a real 30K+ vocab
    # should use a scalar-prefetch / DMA row gather instead.
    # (No guard that input_ids < VOCAB: OOB ids silently produce a zero row.)
    ids = ids_ref[0]                                                  # [S, 1] int32
    onehot = (lax.broadcasted_iota(jnp.int32, (S, VOCAB), 1) == ids).astype(f32)
    tok = jnp.dot(onehot, tok_ref[...], preferred_element_type=f32)   # [S, D]
    pos = h_ref[0:S, 0:D]                                             # [S, D]
    eg = h_ref[ROW_VEC:ROW_VEC + 1, 0:D]
    eb = h_ref[ROW_VEC:ROW_VEC + 1, D:2 * D]
    x = _ln(tok + pos, eg, eb)                                        # [S, D] f32

    bias = bias_ref[0]                                                # [1, S] additive key mask
    scale = 1.0 / (DH ** 0.5)

    # ---- encoder layers (static unroll; per-layer slabs sliced from refs) ----
    for l in range(LAYERS):
        wqkv = w_ref[l, 0:D, 0:3 * D]                                 # [D, 3D] bf16
        wo = w_ref[l, 0:D, 3 * D:4 * D]                               # [D, D]  bf16
        w1 = w_ref[l, D:2 * D, 0:FFN]                                 # [D, FFN] bf16
        w2 = w_ref[l, 2 * D:2 * D + FFN, 0:D]                         # [FFN, D] bf16
        bqkv = b_ref[l, 0:1, 0:3 * D]
        bo = b_ref[l, 0:1, 3 * D:4 * D]
        l1g = b_ref[l, 1:2, 0:D]
        l1b = b_ref[l, 1:2, D:2 * D]
        b1 = b_ref[l, 1:2, 2 * D:2 * D + FFN]
        b2 = b_ref[l, 2:3, 0:D]
        l2g = b_ref[l, 2:3, D:2 * D]
        l2b = b_ref[l, 2:3, 2 * D:3 * D]

        # fused QKV projection: ONE MXU op, heads concatenated on the lane axis
        qkv = jnp.dot(x.astype(bf16), wqkv, preferred_element_type=f32) + bqkv  # [S, 3D]

        ctx_heads = []
        for h in range(H):                                            # H=2, static
            qh = qkv[:, h * DH:(h + 1) * DH]                          # [S, DH]
            kh = qkv[:, D + h * DH:D + (h + 1) * DH]
            vh = qkv[:, 2 * D + h * DH:2 * D + (h + 1) * DH]
            s = lax.dot_general(qh, kh, (((1,), (1,)), ((), ())),
                                preferred_element_type=f32) * scale + bias       # [S, S]
            m = jnp.max(s, axis=-1, keepdims=True)
            e = jnp.exp(s - m)
            p = e * pl.reciprocal(jnp.sum(e, axis=-1, keepdims=True), approx=True)
            ctx_heads.append(jnp.dot(p, vh, preferred_element_type=f32))          # [S, DH]
        ctx = jnp.concatenate(ctx_heads, axis=-1)                     # [S, D] heads on lanes

        # single output projection over all heads (no per-head matmul / sum)
        attn = jnp.dot(ctx.astype(bf16), wo, preferred_element_type=f32) + bo
        x1 = _ln(x + attn, l1g, l1b)                                  # post-LN (BERT)

        hid = jnp.dot(x1.astype(bf16), w1, preferred_element_type=f32) + b1
        # TODO(synk): HF BERT default activation is exact erf-GELU; tanh
        # approximation is used here (small numeric drift, no checkpoint anyway).
        hid = jax.nn.gelu(hid, approximate=True)
        ffn = jnp.dot(hid.astype(bf16), w2, preferred_element_type=f32) + b2
        x = _ln(x1 + ffn, l2g, l2b)                                   # [S, D]

    # ---- CLS pooler + classifier + exact softmax (lane-dense 128-wide store) --
    cls = x[0:1, :]                                                   # [1, D] token 0
    poolw = h_ref[ROW_POOLW:ROW_POOLW + D, 0:D]
    poolb = h_ref[ROW_VEC:ROW_VEC + 1, 2 * D:3 * D]
    clsw = h_ref[ROW_CLSW:ROW_CLSW + D, :]                            # [D, PAD_N]
    clsb = h_ref[ROW_CLSB:ROW_CLSB + 1, :]                            # [1, PAD_N]
    pooled = jnp.tanh(jnp.dot(cls, poolw, preferred_element_type=jnp.float32) + poolb)
    logits = jnp.dot(pooled, clsw, preferred_element_type=jnp.float32) + clsb
    lm = jnp.max(logits, axis=-1, keepdims=True)
    le = jnp.exp(logits - lm)                                         # padded cols -> exactly 0
    o_ref[0] = le / jnp.sum(le, axis=-1, keepdims=True)               # [1, PAD_N]


# ---------------- parameter init (deterministic) + slab packing ----------------
def init_params(key):
    def nrm(k, shape):
        return 0.02 * jax.random.normal(k, shape, dtype=jnp.float32)

    ks = jax.random.split(key, 8)
    ones = lambda s: jnp.ones(s, jnp.float32)
    zeros = lambda s: jnp.zeros(s, jnp.float32)
    return {
        'tok_emb': nrm(ks[0], (VOCAB, D)),
        'pos_emb': nrm(ks[1], (MAX_POS, D)),
        'emb_ln_g': ones((D,)), 'emb_ln_b': zeros((D,)),
        # q|k|v fused on the output (lane) axis; head h occupies cols h*DH:(h+1)*DH
        'wqkv': nrm(ks[2], (LAYERS, D, 3 * D)), 'bqkv': zeros((LAYERS, 3 * D)),
        # output projection takes lane-concatenated heads [H*DH] -> D
        'wo': nrm(ks[3], (LAYERS, D, D)), 'bo': zeros((LAYERS, D)),
        'ln1_g': ones((LAYERS, D)), 'ln1_b': zeros((LAYERS, D)),
        'w1': nrm(ks[4], (LAYERS, D, FFN)), 'b1': zeros((LAYERS, FFN)),
        'w2': nrm(ks[5], (LAYERS, FFN, D)), 'b2': zeros((LAYERS, D)),
        'ln2_g': ones((LAYERS, D)), 'ln2_b': zeros((LAYERS, D)),
        'pooler_w': nrm(ks[6], (D, D)), 'pooler_b': zeros((D,)),
        'cls_w': nrm(ks[7], (D, NUM_LABELS)), 'cls_b': zeros((NUM_LABELS,)),
    }


def pack_params(p):
    """Pack all parameters into 4 lane-dense slabs (few large DMAs instead of ~26 tiny ones)."""
    # per-layer big matrices -> bf16 MXU operands
    wslab = jnp.zeros((LAYERS, WSLAB_ROWS, 128), jnp.float32)
    wslab = wslab.at[:, 0:D, 0:3 * D].set(p['wqkv'])
    wslab = wslab.at[:, 0:D, 3 * D:4 * D].set(p['wo'])
    wslab = wslab.at[:, D:2 * D, 0:FFN].set(p['w1'])
    wslab = wslab.at[:, 2 * D:2 * D + FFN, 0:D].set(p['w2'])
    wslab = wslab.astype(jnp.bfloat16)

    # per-layer biases / LayerNorm params (kept f32 for VPU math)
    bslab = jnp.zeros((LAYERS, BSLAB_ROWS, 128), jnp.float32)
    bslab = bslab.at[:, 0, 0:3 * D].set(p['bqkv'])
    bslab = bslab.at[:, 0, 3 * D:4 * D].set(p['bo'])
    bslab = bslab.at[:, 1, 0:D].set(p['ln1_g'])
    bslab = bslab.at[:, 1, D:2 * D].set(p['ln1_b'])
    bslab = bslab.at[:, 1, 2 * D:2 * D + FFN].set(p['b1'])
    bslab = bslab.at[:, 2, 0:D].set(p['b2'])
    bslab = bslab.at[:, 2, D:2 * D].set(p['ln2_g'])
    bslab = bslab.at[:, 2, 2 * D:3 * D].set(p['ln2_b'])

    # embeddings-misc + pooler + classifier head
    hslab = jnp.zeros((HSLAB_ROWS, 128), jnp.float32)
    hslab = hslab.at[0:MAX_POS, 0:D].set(p['pos_emb'])
    hslab = hslab.at[ROW_POOLW:ROW_POOLW + D, 0:D].set(p['pooler_w'])
    hslab = hslab.at[ROW_CLSW:ROW_CLSW + D, 0:NUM_LABELS].set(p['cls_w'])
    hslab = hslab.at[ROW_VEC, 0:D].set(p['emb_ln_g'])
    hslab = hslab.at[ROW_VEC, D:2 * D].set(p['emb_ln_b'])
    hslab = hslab.at[ROW_VEC, 2 * D:3 * D].set(p['pooler_b'])
    hslab = hslab.at[ROW_CLSB, :].set(NEG_PAD)                # padded logits -> -1e30
    hslab = hslab.at[ROW_CLSB, 0:NUM_LABELS].set(p['cls_b'])

    return {'tok_emb': p['tok_emb'], 'wslab': wslab, 'bslab': bslab, 'hslab': hslab}


# ---------------- forward (matches HF.forward semantics) ----------------
def hf_forward(packed, input_ids, attention_mask):
    B, S = input_ids.shape
    assert S <= MAX_POS, "sequence length exceeds max position embeddings"

    ids3d = input_ids.astype(jnp.int32).reshape(B, S, 1)
    # additive key-padding bias precomputed in the wrapper (no in-kernel mask build)
    bias3d = jnp.where(attention_mask.astype(jnp.float32) > 0.5,
                       0.0, NEG_MASK).astype(jnp.float32).reshape(B, 1, S)

    prob_padded = pl.pallas_call(
        functools.partial(_seq_kernel, S),
        grid=(B,),
        in_specs=[
            pl.BlockSpec((1, S, 1), lambda b: (b, 0, 0)),                       # ids
            pl.BlockSpec((1, 1, S), lambda b: (b, 0, 0)),                       # key mask bias
            pl.BlockSpec((VOCAB, D), lambda b: (0, 0)),                         # tok_emb
            pl.BlockSpec((LAYERS, WSLAB_ROWS, 128), lambda b: (0, 0, 0)),       # wslab (bf16)
            pl.BlockSpec((LAYERS, BSLAB_ROWS, 128), lambda b: (0, 0, 0)),       # bslab
            pl.BlockSpec((HSLAB_ROWS, 128), lambda b: (0, 0)),                  # hslab
        ],
        out_specs=pl.BlockSpec((1, 1, PAD_N), lambda b: (b, 0, 0)),
        out_shape=jax.ShapeDtypeStruct((B, 1, PAD_N), jnp.float32),
        compiler_params=pltpu.CompilerParams(dimension_semantics=("parallel",)),
    )(ids3d, bias3d, packed['tok_emb'], packed['wslab'], packed['bslab'], packed['hslab'])

    return prob_padded[:, 0, :NUM_LABELS]          # softmax probs [B, NUM_LABELS]


if __name__ == "__main__":
    key = jax.random.PRNGKey(0)
    pkey, dkey = jax.random.split(key)
    packed = pack_params(init_params(pkey))

    B, S = 2, 8
    input_ids = jax.random.randint(dkey, (B, S), 0, VOCAB, dtype=jnp.int32)
    attention_mask = jnp.array([[1, 1, 1, 1, 1, 1, 1, 1],
                                [1, 1, 1, 1, 1, 1, 0, 0]], dtype=jnp.int32)

    fwd = jax.jit(hf_forward)
    prob = jax.block_until_ready(fwd(packed, input_ids, attention_mask))

    assert prob.shape == (B, NUM_LABELS)
    assert bool(jnp.all(jnp.abs(jnp.sum(prob, axis=-1) - 1.0) < 1e-5))
    print("KERNEL_OK")
</pallas_src>

<mosaic_0001>
module attributes {stable_mosaic.version = 11 : i64} {
  func.func @_seq_kernel(%arg0: i32, %arg1: memref<1x8x1xi32, #tpu.memory_space<vmem>>, %arg2: memref<1x1x8xf32, #tpu.memory_space<vmem>>, %arg3: memref<100x32xf32, #tpu.memory_space<vmem>>, %arg4: memref<2x128x128xbf16, #tpu.memory_space<vmem>>, %arg5: memref<2x8x128xf32, #tpu.memory_space<vmem>>, %arg6: memref<88x128xf32, #tpu.memory_space<vmem>>, %arg7: memref<1x1x128xf32, #tpu.memory_space<vmem>>) attributes {dimension_semantics = [#tpu.dimension_semantics<parallel>], iteration_bounds = array<i64: 2>, scalar_prefetch = 0 : i64, scratch_operands = 0 : i64, tpu.core_type = #tpu.core_type<tc>, window_params = [{transform_indices = @transform_0, window_bounds = array<i64: 1, 8, 1>}, {transform_indices = @transform_1, window_bounds = array<i64: 1, 1, 8>}, {pipeline_mode = #tpu.pipeline_mode<synchronous>, transform_indices = @transform_2, window_bounds = array<i64: 100, 32>}, {pipeline_mode = #tpu.pipeline_mode<synchronous>, transform_indices = @transform_3, window_bounds = array<i64: 2, 128, 128>}, {pipeline_mode = #tpu.pipeline_mode<synchronous>, transform_indices = @transform_4, window_bounds = array<i64: 2, 8, 128>}, {pipeline_mode = #tpu.pipeline_mode<synchronous>, transform_indices = @transform_5, window_bounds = array<i64: 88, 128>}, {transform_indices = @transform_6, window_bounds = array<i64: 1, 1, 128>}]} {
    %c0 = arith.constant 0 : index
    %c0_0 = arith.constant 0 : index
    %c0_1 = arith.constant 0 : index
    %0 = vector.load %arg1[%c0, %c0_0, %c0_1] : memref<1x8x1xi32, #tpu.memory_space<vmem>>, vector<1x8x1xi32>
    %1 = vector.shape_cast %0 : vector<1x8x1xi32> to vector<8x1xi32>
    %2 = tpu.iota {dimensions = array<i32: 1>} : vector<8x100xi32>
    %3 = vector.broadcast %1 : vector<8x1xi32> to vector<8x100xi32>
    %4 = arith.cmpi eq, %2, %3 : vector<8x100xi32>
    %5 = arith.extui %4 : vector<8x100xi1> to vector<8x100xi32>
    %6 = arith.sitofp %5 : vector<8x100xi32> to vector<8x100xf32>
    %c0_2 = arith.constant 0 : index
    %c0_3 = arith.constant 0 : index
    %7 = vector.load %arg3[%c0_2, %c0_3] : memref<100x32xf32, #tpu.memory_space<vmem>>, vector<100x32xf32>
    %cst = arith.constant dense<0.000000e+00> : vector<8x32xf32>
    %8 = tpu.matmul %6, %7, %cst {dimension_numbers = #tpu.dot_dimension_numbers<[1], [0], [0], [1], [0, 0, 1, 1], [], []>} : vector<8x100xf32>, vector<100x32xf32>, vector<8x32xf32> -> vector<8x32xf32>
    %c0_4 = arith.constant 0 : index
    %c0_5 = arith.constant 0 : index
    %9 = vector.load %arg6[%c0_4, %c0_5] : memref<88x128xf32, #tpu.memory_space<vmem>>, vector<8x32xf32>
    %c80 = arith.constant 80 : index
    %c0_6 = arith.constant 0 : index
    %10 = vector.load %arg6[%c80, %c0_6] : memref<88x128xf32, #tpu.memory_space<vmem>>, vector<1x32xf32>
    %c80_7 = arith.constant 80 : index
    %c32 = arith.constant 32 : index
    %11 = vector.load %arg6[%c80_7, %c32] : memref<88x128xf32, #tpu.memory_space<vmem>>, vector<1x32xf32>
    %12 = arith.addf %8, %9 : vector<8x32xf32>
    %cst_8 = arith.constant dense<0.000000e+00> : vector<8xf32>
    %13 = vector.multi_reduction <add>, %12, %cst_8 [1] : vector<8x32xf32> to vector<8xf32>
    %14 = vector.shape_cast %13 : vector<8xf32> to vector<8x1xf32>
    %cst_9 = arith.constant 3.200000e+01 : f32
    %15 = vector.broadcast %cst_9 : f32 to vector<8x1xf32>
    %16 = arith.divf %14, %15 : vector<8x1xf32>
    %17 = vector.broadcast %16 : vector<8x1xf32> to vector<8x32xf32>
    %18 = arith.subf %12, %17 : vector<8x32xf32>
    %19 = arith.mulf %18, %18 : vector<8x32xf32>
    %cst_10 = arith.constant dense<0.000000e+00> : vector<8xf32>
    %20 = vector.multi_reduction <add>, %19, %cst_10 [1] : vector<8x32xf32> to vector<8xf32>
    %21 = vector.shape_cast %20 : vector<8xf32> to vector<8x1xf32>
    %cst_11 = arith.constant 3.200000e+01 : f32
    %22 = vector.broadcast %cst_11 : f32 to vector<8x1xf32>
    %23 = arith.divf %21, %22 : vector<8x1xf32>
    %24 = vector.broadcast %16 : vector<8x1xf32> to vector<8x32xf32>
    %25 = arith.subf %12, %24 : vector<8x32xf32>
    %cst_12 = arith.constant 9.99999996E-13 : f32
    %26 = vector.broadcast %cst_12 : f32 to vector<8x1xf32>
    %27 = arith.addf %23, %26 : vector<8x1xf32>
    %28 = math.rsqrt %27 : vector<8x1xf32>
    %29 = vector.broadcast %28 : vector<8x1xf32> to vector<8x32xf32>
    %30 = arith.mulf %25, %29 : vector<8x32xf32>
    %31 = vector.broadcast %10 : vector<1x32xf32> to vector<8x32xf32>
    %32 = arith.mulf %30, %31 : vector<8x32xf32>
    %33 = vector.broadcast %11 : vector<1x32xf32> to vector<8x32xf32>
    %34 = arith.addf %32, %33 : vector<8x32xf32>
    %c0_13 = arith.constant 0 : index
    %c0_14 = arith.constant 0 : index
    %c0_15 = arith.constant 0 : index
    %35 = vector.load %arg2[%c0_13, %c0_14, %c0_15] : memref<1x1x8xf32, #tpu.memory_space<vmem>>, vector<1x1x8xf32>
    %36 = vector.shape_cast %35 : vector<1x1x8xf32> to vector<1x8xf32>
    %c0_16 = arith.constant 0 : index
    %c0_17 = arith.constant 0 : index
    %c0_18 = arith.constant 0 : index
    %37 = vector.load %arg4[%c0_16, %c0_17, %c0_18] : memref<2x128x128xbf16, #tpu.memory_space<vmem>>, vector<1x32x96xbf16>
    %38 = vector.shape_cast %37 : vector<1x32x96xbf16> to vector<32x96xbf16>
    %c0_19 = arith.constant 0 : index
    %c0_20 = arith.constant 0 : index
    %c96 = arith.constant 96 : index
    %39 = vector.load %arg4[%c0_19, %c0_20, %c96] : memref<2x128x128xbf16, #tpu.memory_space<vmem>>, vector<1x32x32xbf16>
    %40 = vector.shape_cast %39 : vector<1x32x32xbf16> to vector<32x32xbf16>
    %c0_21 = arith.constant 0 : index
    %c32_22 = arith.constant 32 : index
    %c0_23 = arith.constant 0 : index
    %41 = vector.load %arg4[%c0_21, %c32_22, %c0_23] : memref<2x128x128xbf16, #tpu.memory_space<vmem>>, vector<1x32x64xbf16>
    %42 = vector.shape_cast %41 : vector<1x32x64xbf16> to vector<32x64xbf16>
    %c0_24 = arith.constant 0 : index
    %c64 = arith.constant 64 : index
    %c0_25 = arith.constant 0 : index
    %43 = vector.load %arg4[%c0_24, %c64, %c0_25] : memref<2x128x128xbf16, #tpu.memory_space<vmem>>, vector<1x64x32xbf16>
    %44 = vector.shape_cast %43 : vector<1x64x32xbf16> to vector<64x32xbf16>
    %c0_26 = arith.constant 0 : index
    %c0_27 = arith.constant 0 : index
    %c0_28 = arith.constant 0 : index
    %45 = vector.load %arg5[%c0_26, %c0_27, %c0_28] : memref<2x8x128xf32, #tpu.memory_space<vmem>>, vector<1x1x96xf32>
    %46 = vector.shape_cast %45 : vector<1x1x96xf32> to vector<1x96xf32>
    %c0_29 = arith.constant 0 : index
    %c0_30 = arith.constant 0 : index
    %c96_31 = arith.constant 96 : index
    %47 = vector.load %arg5[%c0_29, %c0_30, %c96_31] : memref<2x8x128xf32, #tpu.memory_space<vmem>>, vector<1x1x32xf32>
    %48 = vector.shape_cast %47 : vector<1x1x32xf32> to vector<1x32xf32>
    %c0_32 = arith.constant 0 : index
    %c1 = arith.constant 1 : index
    %c0_33 = arith.constant 0 : index
    %49 = vector.load %arg5[%c0_32, %c1, %c0_33] : memref<2x8x128xf32, #tpu.memory_space<vmem>>, vector<1x1x32xf32>
    %50 = vector.shape_cast %49 : vector<1x1x32xf32> to vector<1x32xf32>
    %c0_34 = arith.constant 0 : index
    %c1_35 = arith.constant 1 : index
    %c32_36 = arith.constant 32 : index
    %51 = vector.load %arg5[%c0_34, %c1_35, %c32_36] : memref<2x8x128xf32, #tpu.memory_space<vmem>>, vector<1x1x32xf32>
    %52 = vector.shape_cast %51 : vector<1x1x32xf32> to vector<1x32xf32>
    %c0_37 = arith.constant 0 : index
    %c1_38 = arith.constant 1 : index
    %c64_39 = arith.constant 64 : index
    %53 = vector.load %arg5[%c0_37, %c1_38, %c64_39] : memref<2x8x128xf32, #tpu.memory_space<vmem>>, vector<1x1x64xf32>
    %54 = vector.shape_cast %53 : vector<1x1x64xf32> to vector<1x64xf32>
    %c0_40 = arith.constant 0 : index
    %c2 = arith.constant 2 : index
    %c0_41 = arith.constant 0 : index
    %55 = vector.load %arg5[%c0_40, %c2, %c0_41] : memref<2x8x128xf32, #tpu.memory_space<vmem>>, vector<1x1x32xf32>
    %56 = vector.shape_cast %55 : vector<1x1x32xf32> to vector<1x32xf32>
    %c0_42 = arith.constant 0 : index
    %c2_43 = arith.constant 2 : index
    %c32_44 = arith.constant 32 : index
    %57 = vector.load %arg5[%c0_42, %c2_43, %c32_44] : memref<2x8x128xf32, #tpu.memory_space<vmem>>, vector<1x1x32xf32>
    %58 = vector.shape_cast %57 : vector<1x1x32xf32> to vector<1x32xf32>
    %c0_45 = arith.constant 0 : index
    %c2_46 = arith.constant 2 : index
    %c64_47 = arith.constant 64 : index
    %59 = vector.load %arg5[%c0_45, %c2_46, %c64_47] : memref<2x8x128xf32, #tpu.memory_space<vmem>>, vector<1x1x32xf32>
    %60 = vector.shape_cast %59 : vector<1x1x32xf32> to vector<1x32xf32>
    %61 = arith.truncf %34 : vector<8x32xf32> to vector<8x32xbf16>
    %cst_48 = arith.constant dense<0.000000e+00> : vector<8x96xf32>
    %62 = tpu.matmul %61, %38, %cst_48 {dimension_numbers = #tpu.dot_dimension_numbers<[1], [0], [0], [1], [0, 0, 1, 1], [], []>} : vector<8x32xbf16>, vector<32x96xbf16>, vector<8x96xf32> -> vector<8x96xf32>
    %63 = vector.broadcast %46 : vector<1x96xf32> to vector<8x96xf32>
    %64 = arith.addf %62, %63 : vector<8x96xf32>
    %65 = vector.extract_strided_slice %64 {offsets = [0, 0], sizes = [8, 16], strides = [1, 1]} : vector<8x96xf32> to vector<8x16xf32>
    %66 = vector.extract_strided_slice %64 {offsets = [0, 32], sizes = [8, 16], strides = [1, 1]} : vector<8x96xf32> to vector<8x16xf32>
    %67 = vector.extract_strided_slice %64 {offsets = [0, 64], sizes = [8, 16], strides = [1, 1]} : vector<8x96xf32> to vector<8x16xf32>
    %cst_49 = arith.constant dense<0.000000e+00> : vector<8x8xf32>
    %68 = tpu.matmul %65, %66, %cst_49 {dimension_numbers = #tpu.dot_dimension_numbers<[1], [1], [0], [0], [0, 0, 1, 0], [], []>} : vector<8x16xf32>, vector<8x16xf32>, vector<8x8xf32> -> vector<8x8xf32>
    %cst_50 = arith.constant 2.500000e-01 : f32
    %69 = vector.broadcast %cst_50 : f32 to vector<8x8xf32>
    %70 = arith.mulf %68, %69 : vector<8x8xf32>
    %71 = vector.broadcast %36 : vector<1x8xf32> to vector<8x8xf32>
    %72 = arith.addf %70, %71 : vector<8x8xf32>
    %cst_51 = arith.constant dense<0xFF800000> : vector<8xf32>
    %73 = vector.multi_reduction <maximumf>, %72, %cst_51 [1] : vector<8x8xf32> to vector<8xf32>
    %74 = vector.shape_cast %73 : vector<8xf32> to vector<8x1xf32>
    %75 = vector.broadcast %74 : vector<8x1xf32> to vector<8x8xf32>
    %76 = arith.subf %72, %75 : vector<8x8xf32>
    %77 = math.exp %76 : vector<8x8xf32>
    %cst_52 = arith.constant dense<0.000000e+00> : vector<8xf32>
    %78 = vector.multi_reduction <add>, %77, %cst_52 [1] : vector<8x8xf32> to vector<8xf32>
    %79 = vector.shape_cast %78 : vector<8xf32> to vector<8x1xf32>
    %80 = tpu.reciprocal %79 {approx = true} : vector<8x1xf32> -> vector<8x1xf32>
    %81 = vector.broadcast %80 : vector<8x1xf32> to vector<8x8xf32>
    %82 = arith.mulf %77, %81 : vector<8x8xf32>
    %cst_53 = arith.constant dense<0.000000e+00> : vector<8x16xf32>
    %83 = tpu.matmul %82, %67, %cst_53 {dimension_numbers = #tpu.dot_dimension_numbers<[1], [0], [0], [1], [0, 0, 1, 1], [], []>} : vector<8x8xf32>, vector<8x16xf32>, vector<8x16xf32> -> vector<8x16xf32>
    %84 = vector.extract_strided_slice %64 {offsets = [0, 16], sizes = [8, 16], strides = [1, 1]} : vector<8x96xf32> to vector<8x16xf32>
    %85 = vector.extract_strided_slice %64 {offsets = [0, 48], sizes = [8, 16], strides = [1, 1]} : vector<8x96xf32> to vector<8x16xf32>
    %86 = vector.extract_strided_slice %64 {offsets = [0, 80], sizes = [8, 16], strides = [1, 1]} : vector<8x96xf32> to vector<8x16xf32>
    %cst_54 = arith.constant dense<0.000000e+00> : vector<8x8xf32>
    %87 = tpu.matmul %84, %85, %cst_54 {dimension_numbers = #tpu.dot_dimension_numbers<[1], [1], [0], [0], [0, 0, 1, 0], [], []>} : vector<8x16xf32>, vector<8x16xf32>, vector<8x8xf32> -> vector<8x8xf32>
    %cst_55 = arith.constant 2.500000e-01 : f32
    %88 = vector.broadcast %cst_55 : f32 to vector<8x8xf32>
    %89 = arith.mulf %87, %88 : vector<8x8xf32>
    %90 = vector.broadcast %36 : vector<1x8xf32> to vector<8x8xf32>
    %91 = arith.addf %89, %90 : vector<8x8xf32>
    %cst_56 = arith.constant dense<0xFF800000> : vector<8xf32>
    %92 = vector.multi_reduction <maximumf>, %91, %cst_56 [1] : vector<8x8xf32> to vector<8xf32>
    %93 = vector.shape_cast %92 : vector<8xf32> to vector<8x1xf32>
    %94 = vector.broadcast %93 : vector<8x1xf32> to vector<8x8xf32>
    %95 = arith.subf %91, %94 : vector<8x8xf32>
    %96 = math.exp %95 : vector<8x8xf32>
    %cst_57 = arith.constant dense<0.000000e+00> : vector<8xf32>
    %97 = vector.multi_reduction <add>, %96, %cst_57 [1] : vector<8x8xf32> to vector<8xf32>
    %98 = vector.shape_cast %97 : vector<8xf32> to vector<8x1xf32>
    %99 = tpu.reciprocal %98 {approx = true} : vector<8x1xf32> -> vector<8x1xf32>
    %100 = vector.broadcast %99 : vector<8x1xf32> to vector<8x8xf32>
    %101 = arith.mulf %96, %100 : vector<8x8xf32>
    %cst_58 = arith.constant dense<0.000000e+00> : vector<8x16xf32>
    %102 = tpu.matmul %101, %86, %cst_58 {dimension_numbers = #tpu.dot_dimension_numbers<[1], [0], [0], [1], [0, 0, 1, 1], [], []>} : vector<8x8xf32>, vector<8x16xf32>, vector<8x16xf32> -> vector<8x16xf32>
    %103 = tpu.concatenate %83, %102 in 1 : vector<8x16xf32>, vector<8x16xf32> -> vector<8x32xf32>
    %104 = arith.truncf %103 : vector<8x32xf32> to vector<8x32xbf16>
    %cst_59 = arith.constant dense<0.000000e+00> : vector<8x32xf32>
    %105 = tpu.matmul %104, %40, %cst_59 {dimension_numbers = #tpu.dot_dimension_numbers<[1], [0], [0], [1], [0, 0, 1, 1], [], []>} : vector<8x32xbf16>, vector<32x32xbf16>, vector<8x32xf32> -> vector<8x32xf32>
    %106 = vector.broadcast %48 : vector<1x32xf32> to vector<8x32xf32>
    %107 = arith.addf %105, %106 : vector<8x32xf32>
    %108 = arith.addf %34, %107 : vector<8x32xf32>
    %cst_60 = arith.constant dense<0.000000e+00> : vector<8xf32>
    %109 = vector.multi_reduction <add>, %108, %cst_60 [1] : vector<8x32xf32> to vector<8xf32>
    %110 = vector.shape_cast %109 : vector<8xf32> to vector<8x1xf32>
    %cst_61 = arith.constant 3.200000e+01 : f32
    %111 = vector.broadcast %cst_61 : f32 to vector<8x1xf32>
    %112 = arith.divf %110, %111 : vector<8x1xf32>
    %113 = vector.broadcast %112 : vector<8x1xf32> to vector<8x32xf32>
    %114 = arith.subf %108, %113 : vector<8x32xf32>
    %115 = arith.mulf %114, %114 : vector<8x32xf32>
    %cst_62 = arith.constant dense<0.000000e+00> : vector<8xf32>
    %116 = vector.multi_reduction <add>, %115, %cst_62 [1] : vector<8x32xf32> to vector<8xf32>
    %117 = vector.shape_cast %116 : vector<8xf32> to vector<8x1xf32>
    %cst_63 = arith.constant 3.200000e+01 : f32
    %118 = vector.broadcast %cst_63 : f32 to vector<8x1xf32>
    %119 = arith.divf %117, %118 : vector<8x1xf32>
    %120 = vector.broadcast %112 : vector<8x1xf32> to vector<8x32xf32>
    %121 = arith.subf %108, %120 : vector<8x32xf32>
    %cst_64 = arith.constant 9.99999996E-13 : f32
    %122 = vector.broadcast %cst_64 : f32 to vector<8x1xf32>
    %123 = arith.addf %119, %122 : vector<8x1xf32>
    %124 = math.rsqrt %123 : vector<8x1xf32>
    %125 = vector.broadcast %124 : vector<8x1xf32> to vector<8x32xf32>
    %126 = arith.mulf %121, %125 : vector<8x32xf32>
    %127 = vector.broadcast %50 : vector<1x32xf32> to vector<8x32xf32>
    %128 = arith.mulf %126, %127 : vector<8x32xf32>
    %129 = vector.broadcast %52 : vector<1x32xf32> to vector<8x32xf32>
    %130 = arith.addf %128, %129 : vector<8x32xf32>
    %131 = arith.truncf %130 : vector<8x32xf32> to vector<8x32xbf16>
    %cst_65 = arith.constant dense<0.000000e+00> : vector<8x64xf32>
    %132 = tpu.matmul %131, %42, %cst_65 {dimension_numbers = #tpu.dot_dimension_numbers<[1], [0], [0], [1], [0, 0, 1, 1], [], []>} : vector<8x32xbf16>, vector<32x64xbf16>, vector<8x64xf32> -> vector<8x64xf32>
    %133 = vector.broadcast %54 : vector<1x64xf32> to vector<8x64xf32>
    %134 = arith.addf %132, %133 : vector<8x64xf32>
    %135 = arith.mulf %134, %134 : vector<8x64xf32>
    %136 = arith.mulf %134, %135 : vector<8x64xf32>
    %cst_66 = arith.constant 4.471500e-02 : f32
    %137 = vector.broadcast %cst_66 : f32 to vector<8x64xf32>
    %138 = arith.mulf %137, %136 : vector<8x64xf32>
    %139 = arith.addf %134, %138 : vector<8x64xf32>
    %cst_67 = arith.constant 0.797884583 : f32
    %140 = vector.broadcast %cst_67 : f32 to vector<8x64xf32>
    %141 = arith.mulf %140, %139 : vector<8x64xf32>
    %142 = math.tanh %141 : vector<8x64xf32>
    %cst_68 = arith.constant 1.000000e+00 : f32
    %143 = vector.broadcast %cst_68 : f32 to vector<8x64xf32>
    %144 = arith.addf %143, %142 : vector<8x64xf32>
    %cst_69 = arith.constant 5.000000e-01 : f32
    %145 = vector.broadcast %cst_69 : f32 to vector<8x64xf32>
    %146 = arith.mulf %145, %144 : vector<8x64xf32>
    %147 = arith.mulf %134, %146 : vector<8x64xf32>
    %148 = arith.truncf %147 : vector<8x64xf32> to vector<8x64xbf16>
    %cst_70 = arith.constant dense<0.000000e+00> : vector<8x32xf32>
    %149 = tpu.matmul %148, %44, %cst_70 {dimension_numbers = #tpu.dot_dimension_numbers<[1], [0], [0], [1], [0, 0, 1, 1], [], []>} : vector<8x64xbf16>, vector<64x32xbf16>, vector<8x32xf32> -> vector<8x32xf32>
    %150 = vector.broadcast %56 : vector<1x32xf32> to vector<8x32xf32>
    %151 = arith.addf %149, %150 : vector<8x32xf32>
    %152 = arith.addf %130, %151 : vector<8x32xf32>
    %cst_71 = arith.constant dense<0.000000e+00> : vector<8xf32>
    %153 = vector.multi_reduction <add>, %152, %cst_71 [1] : vector<8x32xf32> to vector<8xf32>
    %154 = vector.shape_cast %153 : vector<8xf32> to vector<8x1xf32>
    %cst_72 = arith.constant 3.200000e+01 : f32
    %155 = vector.broadcast %cst_72 : f32 to vector<8x1xf32>
    %156 = arith.divf %154, %155 : vector<8x1xf32>
    %157 = vector.broadcast %156 : vector<8x1xf32> to vector<8x32xf32>
    %158 = arith.subf %152, %157 : vector<8x32xf32>
    %159 = arith.mulf %158, %158 : vector<8x32xf32>
    %cst_73 = arith.constant dense<0.000000e+00> : vector<8xf32>
    %160 = vector.multi_reduction <add>, %159, %cst_73 [1] : vector<8x32xf32> to vector<8xf32>
    %161 = vector.shape_cast %160 : vector<8xf32> to vector<8x1xf32>
    %cst_74 = arith.constant 3.200000e+01 : f32
    %162 = vector.broadcast %cst_74 : f32 to vector<8x1xf32>
    %163 = arith.divf %161, %162 : vector<8x1xf32>
    %164 = vector.broadcast %156 : vector<8x1xf32> to vector<8x32xf32>
    %165 = arith.subf %152, %164 : vector<8x32xf32>
    %cst_75 = arith.constant 9.99999996E-13 : f32
    %166 = vector.broadcast %cst_75 : f32 to vector<8x1xf32>
    %167 = arith.addf %163, %166 : vector<8x1xf32>
    %168 = math.rsqrt %167 : vector<8x1xf32>
    %169 = vector.broadcast %168 : vector<8x1xf32> to vector<8x32xf32>
    %170 = arith.mulf %165, %169 : vector<8x32xf32>
    %171 = vector.broadcast %58 : vector<1x32xf32> to vector<8x32xf32>
    %172 = arith.mulf %170, %171 : vector<8x32xf32>
    %173 = vector.broadcast %60 : vector<1x32xf32> to vector<8x32xf32>
    %174 = arith.addf %172, %173 : vector<8x32xf32>
    %c1_76 = arith.constant 1 : index
    %c0_77 = arith.constant 0 : index
    %c0_78 = arith.constant 0 : index
    %175 = vector.load %arg4[%c1_76, %c0_77, %c0_78] : memref<2x128x128xbf16, #tpu.memory_space<vmem>>, vector<1x32x96xbf16>
    %176 = vector.shape_cast %175 : vector<1x32x96xbf16> to vector<32x96xbf16>
    %c1_79 = arith.constant 1 : index
    %c0_80 = arith.constant 0 : index
    %c96_81 = arith.constant 96 : index
    %177 = vector.load %arg4[%c1_79, %c0_80, %c96_81] : memref<2x128x128xbf16, #tpu.memory_space<vmem>>, vector<1x32x32xbf16>
    %178 = vector.shape_cast %177 : vector<1x32x32xbf16> to vector<32x32xbf16>
    %c1_82 = arith.constant 1 : index
    %c32_83 = arith.constant 32 : index
    %c0_84 = arith.constant 0 : index
    %179 = vector.load %arg4[%c1_82, %c32_83, %c0_84] : memref<2x128x128xbf16, #tpu.memory_space<vmem>>, vector<1x32x64xbf16>
    %180 = vector.shape_cast %179 : vector<1x32x64xbf16> to vector<32x64xbf16>
    %c1_85 = arith.constant 1 : index
    %c64_86 = arith.constant 64 : index
    %c0_87 = arith.constant 0 : index
    %181 = vector.load %arg4[%c1_85, %c64_86, %c0_87] : memref<2x128x128xbf16, #tpu.memory_space<vmem>>, vector<1x64x32xbf16>
    %182 = vector.shape_cast %181 : vector<1x64x32xbf16> to vector<64x32xbf16>
    %c1_88 = arith.constant 1 : index
    %c0_89 = arith.constant 0 : index
    %c0_90 = arith.constant 0 : index
    %183 = vector.load %arg5[%c1_88, %c0_89, %c0_90] : memref<2x8x128xf32, #tpu.memory_space<vmem>>, vector<1x1x96xf32>
    %184 = vector.shape_cast %183 : vector<1x1x96xf32> to vector<1x96xf32>
    %c1_91 = arith.constant 1 : index
    %c0_92 = arith.constant 0 : index
    %c96_93 = arith.constant 96 : index
    %185 = vector.load %arg5[%c1_91, %c0_92, %c96_93] : memref<2x8x128xf32, #tpu.memory_space<vmem>>, vector<1x1x32xf32>
    %186 = vector.shape_cast %185 : vector<1x1x32xf32> to vector<1x32xf32>
    %c1_94 = arith.constant 1 : index
    %c1_95 = arith.constant 1 : index
    %c0_96 = arith.constant 0 : index
    %187 = vector.load %arg5[%c1_94, %c1_95, %c0_96] : memref<2x8x128xf32, #tpu.memory_space<vmem>>, vector<1x1x32xf32>
    %188 = vector.shape_cast %187 : vector<1x1x32xf32> to vector<1x32xf32>
    %c1_97 = arith.constant 1 : index
    %c1_98 = arith.constant 1 : index
    %c32_99 = arith.constant 32 : index
    %189 = vector.load %arg5[%c1_97, %c1_98, %c32_99] : memref<2x8x128xf32, #tpu.memory_space<vmem>>, vector<1x1x32xf32>
    %190 = vector.shape_cast %189 : vector<1x1x32xf32> to vector<1x32xf32>
    %c1_100 = arith.constant 1 : index
    %c1_101 = arith.constant 1 : index
    %c64_102 = arith.constant 64 : index
    %191 = vector.load %arg5[%c1_100, %c1_101, %c64_102] : memref<2x8x128xf32, #tpu.memory_space<vmem>>, vector<1x1x64xf32>
    %192 = vector.shape_cast %191 : vector<1x1x64xf32> to vector<1x64xf32>
    %c1_103 = arith.constant 1 : index
    %c2_104 = arith.constant 2 : index
    %c0_105 = arith.constant 0 : index
    %193 = vector.load %arg5[%c1_103, %c2_104, %c0_105] : memref<2x8x128xf32, #tpu.memory_space<vmem>>, vector<1x1x32xf32>
    %194 = vector.shape_cast %193 : vector<1x1x32xf32> to vector<1x32xf32>
    %c1_106 = arith.constant 1 : index
    %c2_107 = arith.constant 2 : index
    %c32_108 = arith.constant 32 : index
    %195 = vector.load %arg5[%c1_106, %c2_107, %c32_108] : memref<2x8x128xf32, #tpu.memory_space<vmem>>, vector<1x1x32xf32>
    %196 = vector.shape_cast %195 : vector<1x1x32xf32> to vector<1x32xf32>
    %c1_109 = arith.constant 1 : index
    %c2_110 = arith.constant 2 : index
    %c64_111 = arith.constant 64 : index
    %197 = vector.load %arg5[%c1_109, %c2_110, %c64_111] : memref<2x8x128xf32, #tpu.memory_space<vmem>>, vector<1x1x32xf32>
    %198 = vector.shape_cast %197 : vector<1x1x32xf32> to vector<1x32xf32>
    %199 = arith.truncf %174 : vector<8x32xf32> to vector<8x32xbf16>
    %cst_112 = arith.constant dense<0.000000e+00> : vector<8x96xf32>
    %200 = tpu.matmul %199, %176, %cst_112 {dimension_numbers = #tpu.dot_dimension_numbers<[1], [0], [0], [1], [0, 0, 1, 1], [], []>} : vector<8x32xbf16>, vector<32x96xbf16>, vector<8x96xf32> -> vector<8x96xf32>
    %201 = vector.broadcast %184 : vector<1x96xf32> to vector<8x96xf32>
    %202 = arith.addf %200, %201 : vector<8x96xf32>
    %203 = vector.extract_strided_slice %202 {offsets = [0, 0], sizes = [8, 16], strides = [1, 1]} : vector<8x96xf32> to vector<8x16xf32>
    %204 = vector.extract_strided_slice %202 {offsets = [0, 32], sizes = [8, 16], strides = [1, 1]} : vector<8x96xf32> to vector<8x16xf32>
    %205 = vector.extract_strided_slice %202 {offsets = [0, 64], sizes = [8, 16], strides = [1, 1]} : vector<8x96xf32> to vector<8x16xf32>
    %cst_113 = arith.constant dense<0.000000e+00> : vector<8x8xf32>
    %206 = tpu.matmul %203, %204, %cst_113 {dimension_numbers = #tpu.dot_dimension_numbers<[1], [1], [0], [0], [0, 0, 1, 0], [], []>} : vector<8x16xf32>, vector<8x16xf32>, vector<8x8xf32> -> vector<8x8xf32>
    %cst_114 = arith.constant 2.500000e-01 : f32
    %207 = vector.broadcast %cst_114 : f32 to vector<8x8xf32>
    %208 = arith.mulf %206, %207 : vector<8x8xf32>
    %209 = vector.broadcast %36 : vector<1x8xf32> to vector<8x8xf32>
    %210 = arith.addf %208, %209 : vector<8x8xf32>
    %cst_115 = arith.constant dense<0xFF800000> : vector<8xf32>
    %211 = vector.multi_reduction <maximumf>, %210, %cst_115 [1] : vector<8x8xf32> to vector<8xf32>
    %212 = vector.shape_cast %211 : vector<8xf32> to vector<8x1xf32>
    %213 = vector.broadcast %212 : vector<8x1xf32> to vector<8x8xf32>
    %214 = arith.subf %210, %213 : vector<8x8xf32>
    %215 = math.exp %214 : vector<8x8xf32>
    %cst_116 = arith.constant dense<0.000000e+00> : vector<8xf32>
    %216 = vector.multi_reduction <add>, %215, %cst_116 [1] : vector<8x8xf32> to vector<8xf32>
    %217 = vector.shape_cast %216 : vector<8xf32> to vector<8x1xf32>
    %218 = tpu.reciprocal %217 {approx = true} : vector<8x1xf32> -> vector<8x1xf32>
    %219 = vector.broadcast %218 : vector<8x1xf32> to vector<8x8xf32>
    %220 = arith.mulf %215, %219 : vector<8x8xf32>
    %cst_117 = arith.constant dense<0.000000e+00> : vector<8x16xf32>
    %221 = tpu.matmul %220, %205, %cst_117 {dimension_numbers = #tpu.dot_dimension_numbers<[1], [0], [0], [1], [0, 0, 1, 1], [], []>} : vector<8x8xf32>, vector<8x16xf32>, vector<8x16xf32> -> vector<8x16xf32>
    %222 = vector.extract_strided_slice %202 {offsets = [0, 16], sizes = [8, 16], strides = [1, 1]} : vector<8x96xf32> to vector<8x16xf32>
    %223 = vector.extract_strided_slice %202 {offsets = [0, 48], sizes = [8, 16], strides = [1, 1]} : vector<8x96xf32> to vector<8x16xf32>
    %224 = vector.extract_strided_slice %202 {offsets = [0, 80], sizes = [8, 16], strides = [1, 1]} : vector<8x96xf32> to vector<8x16xf32>
    %cst_118 = arith.constant dense<0.000000e+00> : vector<8x8xf32>
    %225 = tpu.matmul %222, %223, %cst_118 {dimension_numbers = #tpu.dot_dimension_numbers<[1], [1], [0], [0], [0, 0, 1, 0], [], []>} : vector<8x16xf32>, vector<8x16xf32>, vector<8x8xf32> -> vector<8x8xf32>
    %cst_119 = arith.constant 2.500000e-01 : f32
    %226 = vector.broadcast %cst_119 : f32 to vector<8x8xf32>
    %227 = arith.mulf %225, %226 : vector<8x8xf32>
    %228 = vector.broadcast %36 : vector<1x8xf32> to vector<8x8xf32>
    %229 = arith.addf %227, %228 : vector<8x8xf32>
    %cst_120 = arith.constant dense<0xFF800000> : vector<8xf32>
    %230 = vector.multi_reduction <maximumf>, %229, %cst_120 [1] : vector<8x8xf32> to vector<8xf32>
    %231 = vector.shape_cast %230 : vector<8xf32> to vector<8x1xf32>
    %232 = vector.broadcast %231 : vector<8x1xf32> to vector<8x8xf32>
    %233 = arith.subf %229, %232 : vector<8x8xf32>
    %234 = math.exp %233 : vector<8x8xf32>
    %cst_121 = arith.constant dense<0.000000e+00> : vector<8xf32>
    %235 = vector.multi_reduction <add>, %234, %cst_121 [1] : vector<8x8xf32> to vector<8xf32>
    %236 = vector.shape_cast %235 : vector<8xf32> to vector<8x1xf32>
    %237 = tpu.reciprocal %236 {approx = true} : vector<8x1xf32> -> vector<8x1xf32>
    %238 = vector.broadcast %237 : vector<8x1xf32> to vector<8x8xf32>
    %239 = arith.mulf %234, %238 : vector<8x8xf32>
    %cst_122 = arith.constant dense<0.000000e+00> : vector<8x16xf32>
    %240 = tpu.matmul %239, %224, %cst_122 {dimension_numbers = #tpu.dot_dimension_numbers<[1], [0], [0], [1], [0, 0, 1, 1], [], []>} : vector<8x8xf32>, vector<8x16xf32>, vector<8x16xf32> -> vector<8x16xf32>
    %241 = tpu.concatenate %221, %240 in 1 : vector<8x16xf32>, vector<8x16xf32> -> vector<8x32xf32>
    %242 = arith.truncf %241 : vector<8x32xf32> to vector<8x32xbf16>
    %cst_123 = arith.constant dense<0.000000e+00> : vector<8x32xf32>
    %243 = tpu.matmul %242, %178, %cst_123 {dimension_numbers = #tpu.dot_dimension_numbers<[1], [0], [0], [1], [0, 0, 1, 1], [], []>} : vector<8x32xbf16>, vector<32x32xbf16>, vector<8x32xf32> -> vector<8x32xf32>
    %244 = vector.broadcast %186 : vector<1x32xf32> to vector<8x32xf32>
    %245 = arith.addf %243, %244 : vector<8x32xf32>
    %246 = arith.addf %174, %245 : vector<8x32xf32>
    %cst_124 = arith.constant dense<0.000000e+00> : vector<8xf32>
    %247 = vector.multi_reduction <add>, %246, %cst_124 [1] : vector<8x32xf32> to vector<8xf32>
    %248 = vector.shape_cast %247 : vector<8xf32> to vector<8x1xf32>
    %cst_125 = arith.constant 3.200000e+01 : f32
    %249 = vector.broadcast %cst_125 : f32 to vector<8x1xf32>
    %250 = arith.divf %248, %249 : vector<8x1xf32>
    %251 = vector.broadcast %250 : vector<8x1xf32> to vector<8x32xf32>
    %252 = arith.subf %246, %251 : vector<8x32xf32>
    %253 = arith.mulf %252, %252 : vector<8x32xf32>
    %cst_126 = arith.constant dense<0.000000e+00> : vector<8xf32>
    %254 = vector.multi_reduction <add>, %253, %cst_126 [1] : vector<8x32xf32> to vector<8xf32>
    %255 = vector.shape_cast %254 : vector<8xf32> to vector<8x1xf32>
    %cst_127 = arith.constant 3.200000e+01 : f32
    %256 = vector.broadcast %cst_127 : f32 to vector<8x1xf32>
    %257 = arith.divf %255, %256 : vector<8x1xf32>
    %258 = vector.broadcast %250 : vector<8x1xf32> to vector<8x32xf32>
    %259 = arith.subf %246, %258 : vector<8x32xf32>
    %cst_128 = arith.constant 9.99999996E-13 : f32
    %260 = vector.broadcast %cst_128 : f32 to vector<8x1xf32>
    %261 = arith.addf %257, %260 : vector<8x1xf32>
    %262 = math.rsqrt %261 : vector<8x1xf32>
    %263 = vector.broadcast %262 : vector<8x1xf32> to vector<8x32xf32>
    %264 = arith.mulf %259, %263 : vector<8x32xf32>
    %265 = vector.broadcast %188 : vector<1x32xf32> to vector<8x32xf32>
    %266 = arith.mulf %264, %265 : vector<8x32xf32>
    %267 = vector.broadcast %190 : vector<1x32xf32> to vector<8x32xf32>
    %268 = arith.addf %266, %267 : vector<8x32xf32>
    %269 = arith.truncf %268 : vector<8x32xf32> to vector<8x32xbf16>
    %cst_129 = arith.constant dense<0.000000e+00> : vector<8x64xf32>
    %270 = tpu.matmul %269, %180, %cst_129 {dimension_numbers = #tpu.dot_dimension_numbers<[1], [0], [0], [1], [0, 0, 1, 1], [], []>} : vector<8x32xbf16>, vector<32x64xbf16>, vector<8x64xf32> -> vector<8x64xf32>
    %271 = vector.broadcast %192 : vector<1x64xf32> to vector<8x64xf32>
    %272 = arith.addf %270, %271 : vector<8x64xf32>
    %273 = arith.mulf %272, %272 : vector<8x64xf32>
    %274 = arith.mulf %272, %273 : vector<8x64xf32>
    %cst_130 = arith.constant 4.471500e-02 : f32
    %275 = vector.broadcast %cst_130 : f32 to vector<8x64xf32>
    %276 = arith.mulf %275, %274 : vector<8x64xf32>
    %277 = arith.addf %272, %276 : vector<8x64xf32>
    %cst_131 = arith.constant 0.797884583 : f32
    %278 = vector.broadcast %cst_131 : f32 to vector<8x64xf32>
    %279 = arith.mulf %278, %277 : vector<8x64xf32>
    %280 = math.tanh %279 : vector<8x64xf32>
    %cst_132 = arith.constant 1.000000e+00 : f32
    %281 = vector.broadcast %cst_132 : f32 to vector<8x64xf32>
    %282 = arith.addf %281, %280 : vector<8x64xf32>
    %cst_133 = arith.constant 5.000000e-01 : f32
    %283 = vector.broadcast %cst_133 : f32 to vector<8x64xf32>
    %284 = arith.mulf %283, %282 : vector<8x64xf32>
    %285 = arith.mulf %272, %284 : vector<8x64xf32>
    %286 = arith.truncf %285 : vector<8x64xf32> to vector<8x64xbf16>
    %cst_134 = arith.constant dense<0.000000e+00> : vector<8x32xf32>
    %287 = tpu.matmul %286, %182, %cst_134 {dimension_numbers = #tpu.dot_dimension_numbers<[1], [0], [0], [1], [0, 0, 1, 1], [], []>} : vector<8x64xbf16>, vector<64x32xbf16>, vector<8x32xf32> -> vector<8x32xf32>
    %288 = vector.broadcast %194 : vector<1x32xf32> to vector<8x32xf32>
    %289 = arith.addf %287, %288 : vector<8x32xf32>
    %290 = arith.addf %268, %289 : vector<8x32xf32>
    %cst_135 = arith.constant dense<0.000000e+00> : vector<8xf32>
    %291 = vector.multi_reduction <add>, %290, %cst_135 [1] : vector<8x32xf32> to vector<8xf32>
    %292 = vector.shape_cast %291 : vector<8xf32> to vector<8x1xf32>
    %cst_136 = arith.constant 3.200000e+01 : f32
    %293 = vector.broadcast %cst_136 : f32 to vector<8x1xf32>
    %294 = arith.divf %292, %293 : vector<8x1xf32>
    %295 = vector.broadcast %294 : vector<8x1xf32> to vector<8x32xf32>
    %296 = arith.subf %290, %295 : vector<8x32xf32>
    %297 = arith.mulf %296, %296 : vector<8x32xf32>
    %cst_137 = arith.constant dense<0.000000e+00> : vector<8xf32>
    %298 = vector.multi_reduction <add>, %297, %cst_137 [1] : vector<8x32xf32> to vector<8xf32>
    %299 = vector.shape_cast %298 : vector<8xf32> to vector<8x1xf32>
    %cst_138 = arith.constant 3.200000e+01 : f32
    %300 = vector.broadcast %cst_138 : f32 to vector<8x1xf32>
    %301 = arith.divf %299, %300 : vector<8x1xf32>
    %302 = vector.broadcast %294 : vector<8x1xf32> to vector<8x32xf32>
    %303 = arith.subf %290, %302 : vector<8x32xf32>
    %cst_139 = arith.constant 9.99999996E-13 : f32
    %304 = vector.broadcast %cst_139 : f32 to vector<8x1xf32>
    %305 = arith.addf %301, %304 : vector<8x1xf32>
    %306 = math.rsqrt %305 : vector<8x1xf32>
    %307 = vector.broadcast %306 : vector<8x1xf32> to vector<8x32xf32>
    %308 = arith.mulf %303, %307 : vector<8x32xf32>
    %309 = vector.broadcast %196 : vector<1x32xf32> to vector<8x32xf32>
    %310 = arith.mulf %308, %309 : vector<8x32xf32>
    %311 = vector.broadcast %198 : vector<1x32xf32> to vector<8x32xf32>
    %312 = arith.addf %310, %311 : vector<8x32xf32>
    %313 = vector.extract_strided_slice %312 {offsets = [0, 0], sizes = [1, 32], strides = [1, 1]} : vector<8x32xf32> to vector<1x32xf32>
    %c16 = arith.constant 16 : index
    %c0_140 = arith.constant 0 : index
    %314 = vector.load %arg6[%c16, %c0_140] : memref<88x128xf32, #tpu.memory_space<vmem>>, vector<32x32xf32>
    %c80_141 = arith.constant 80 : index
    %c64_142 = arith.constant 64 : index
    %315 = vector.load %arg6[%c80_141, %c64_142] : memref<88x128xf32, #tpu.memory_space<vmem>>, vector<1x32xf32>
    %c48 = arith.constant 48 : index
    %c0_143 = arith.constant 0 : index
    %316 = vector.load %arg6[%c48, %c0_143] : memref<88x128xf32, #tpu.memory_space<vmem>>, vector<32x128xf32>
    %c81 = arith.constant 81 : index
    %c0_144 = arith.constant 0 : index
    %317 = vector.load %arg6[%c81, %c0_144] : memref<88x128xf32, #tpu.memory_space<vmem>>, vector<1x128xf32>
    %cst_145 = arith.constant dense<0.000000e+00> : vector<1x32xf32>
    %318 = tpu.matmul %313, %314, %cst_145 {dimension_numbers = #tpu.dot_dimension_numbers<[1], [0], [0], [1], [0, 0, 1, 1], [], []>} : vector<1x32xf32>, vector<32x32xf32>, vector<1x32xf32> -> vector<1x32xf32>
    %319 = arith.addf %318, %315 : vector<1x32xf32>
    %320 = math.tanh %319 : vector<1x32xf32>
    %cst_146 = arith.constant dense<0.000000e+00> : vector<1x128xf32>
    %321 = tpu.matmul %320, %316, %cst_146 {dimension_numbers = #tpu.dot_dimension_numbers<[1], [0], [0], [1], [0, 0, 1, 1], [], []>} : vector<1x32xf32>, vector<32x128xf32>, vector<1x128xf32> -> vector<1x128xf32>
    %322 = arith.addf %321, %317 : vector<1x128xf32>
    %cst_147 = arith.constant dense<0xFF800000> : vector<1xf32>
    %323 = vector.multi_reduction <maximumf>, %322, %cst_147 [1] : vector<1x128xf32> to vector<1xf32>
    %324 = vector.shape_cast %323 : vector<1xf32> to vector<1x1xf32>
    %325 = vector.broadcast %324 : vector<1x1xf32> to vector<1x128xf32>
    %326 = arith.subf %322, %325 : vector<1x128xf32>
    %327 = math.exp %326 : vector<1x128xf32>
    %cst_148 = arith.constant dense<0.000000e+00> : vector<1xf32>
    %328 = vector.multi_reduction <add>, %327, %cst_148 [1] : vector<1x128xf32> to vector<1xf32>
    %329 = vector.shape_cast %328 : vector<1xf32> to vector<1x1xf32>
    %330 = vector.broadcast %329 : vector<1x1xf32> to vector<1x128xf32>
    %331 = arith.divf %327, %330 : vector<1x128xf32>
    %c0_149 = arith.constant 0 : index
    %c0_150 = arith.constant 0 : index
    %c0_151 = arith.constant 0 : index
    %332 = vector.load %arg7[%c0_149, %c0_150, %c0_151] : memref<1x1x128xf32, #tpu.memory_space<vmem>>, vector<1x1x128xf32>
    %333 = vector.shape_cast %332 : vector<1x1x128xf32> to vector<1x128xf32>
    %334 = vector.shape_cast %331 : vector<1x128xf32> to vector<1x1x128xf32>
    tpu.vector_store %arg7[%c0_149, %c0_150, %c0_151], %334 {strides = array<i32>} : memref<1x1x128xf32, #tpu.memory_space<vmem>>, vector<1x1x128xf32>,
    return
  }
  func.func @transform_0(%arg0: i32) -> (i32, i32, i32) {
    %c0_i32 = arith.constant 0 : i32
    %c0_i32_0 = arith.constant 0 : i32
    %c0_i32_1 = arith.constant 0 : i32
    return %arg0, %c0_i32, %c0_i32_0 : i32, i32, i32
  }
  func.func @transform_1(%arg0: i32) -> (i32, i32, i32) {
    %c0_i32 = arith.constant 0 : i32
    %c0_i32_0 = arith.constant 0 : i32
    %c0_i32_1 = arith.constant 0 : i32
    return %arg0, %c0_i32, %c0_i32_0 : i32, i32, i32
  }
  func.func @transform_2(%arg0: i32) -> (i32, i32) {
    %c0_i32 = arith.constant 0 : i32
    %c0_i32_0 = arith.constant 0 : i32
    %c0_i32_1 = arith.constant 0 : i32
    return %c0_i32, %c0_i32_0 : i32, i32
  }
  func.func @transform_3(%arg0: i32) -> (i32, i32, i32) {
    %c0_i32 = arith.constant 0 : i32
    %c0_i32_0 = arith.constant 0 : i32
    %c0_i32_1 = arith.constant 0 : i32
    %c0_i32_2 = arith.constant 0 : i32
    return %c0_i32, %c0_i32_0, %c0_i32_1 : i32, i32, i32
  }
  func.func @transform_4(%arg0: i32) -> (i32, i32, i32) {
    %c0_i32 = arith.constant 0 : i32
    %c0_i32_0 = arith.constant 0 : i32
    %c0_i32_1 = arith.constant 0 : i32
    %c0_i32_2 = arith.constant 0 : i32
    return %c0_i32, %c0_i32_0, %c0_i32_1 : i32, i32, i32
  }
  func.func @transform_5(%arg0: i32) -> (i32, i32) {
    %c0_i32 = arith.constant 0 : i32
    %c0_i32_0 = arith.constant 0 : i32
    %c0_i32_1 = arith.constant 0 : i32
    return %c0_i32, %c0_i32_0 : i32, i32
  }
  func.func @transform_6(%arg0: i32) -> (i32, i32, i32) {
    %c0_i32 = arith.constant 0 : i32
    %c0_i32_0 = arith.constant 0 : i32
    %c0_i32_1 = arith.constant 0 : i32
    return %arg0, %c0_i32, %c0_i32_0 : i32, i32, i32
  }
}

</mosaic_0001>

<bundles_post_ra>
// kernel: hf_forward.1
= control target key start
LH: loop header
LB: loop body
LE: loop exit
PB: predicated region body
PF: predicated region fallthrough
CT: control target
= control target key end

     0   :  { %11 = vsyncpa [#allocation3], 0  ;;  %s3032_s0 = inlined_call_operand.vmem [shape: s32[2,8,1], index: 0, kind: input, shape index: {}]   ;;  %s3033_s1 = inlined_call_operand.vmem [shape: f32[2,1,8], index: 1, kind: input, shape index: {}]   ;;  %s3034_s2 = inlined_call_operand.vmem [shape: f32[100,32], index: 2, kind: input, shape index: {}]   ;;  %s3035_s3 = inlined_call_operand.vmem [shape: bf16[2,128,128], index: 3, kind: input, shape index: {}]   ;;  %s3036_s4 = inlined_call_operand.vmem [shape: f32[2,8,128], index: 4, kind: input, shape index: {}]   ;;  %s3037_s5 = inlined_call_operand.hbm [shape: f32[88,128], index: 5, kind: input, shape index: {}]   ;;  %s3038_s6 = inlined_call_operand.hbm [shape: f32[2,1,128], index: 6, kind: output, shape index: {}]  }
   0x1   :  { %12 = vsyncpa [#allocation4], 0 }
   0x2   :  { %14 = vsyncpa [#allocation4 + $0x1], 0  ;;  %s2593_s21 = smov 0   ;;  %s2595_s22 = smov 0  }
   0x3   :  { %s2597_s23 = smov 0   ;;  %s2599_s24 = smov 0  }
   0x4 LB: > { %s2614_s25 = sadd.s32 4294967295, %s2541_s24   ;;  %s1993_s26 = sadd.s32 4294967294, %s2541_s24   ;;  %s2541_s24 = sphi %s2599_s24, %s3054_s24   ;;  %s2537_s23 = sphi %s2597_s23, %s3053_s23   ;;  %s2533_s22 = sphi %s2595_s22, %s3052_s22   ;;  %s2529_s21 = sphi %s2593_s21, %s3051_s21  }
   0x5   : > { %s2618_s27 = sadd.s32 1, %s2541_s24   ;;  %s163_s28 = sadd.s32 1, %s2537_s23 }
   0x6   : > { %s160_s29 = ssub.s32 %s2541_s24, %s2618_s27  ;;  %p173_p0 = scmp.ne.s32.totalorder %s2537_s23, %s2533_s22 }
   0x7   : > { %p161_p1 = scmp.eq.s32.totalorder %s160_s29, 0  ;;  %p174_p2 = scmp.eq.s32.totalorder %s2614_s25, 1 }
   0x8   : > { %p179_p3 = scmp.ne.s32.totalorder %s2533_s22, %s2529_s21  ;;  %p180_p4 = scmp.eq.s32.totalorder %s1993_s26, 1 }
   0x9   : > { %s2629_s30 = scalar_select %p161_p1, %s2537_s23, %s163_s28  }
   0xa   : > { %p2631_p5 = por %p174_p2, %p173_p0  ;;  %p2635_p6 = por %p180_p4, %p179_p3 }
   0xb   : > { %p1994_p7 = scmp.ge.s32.totalorder %s2541_s24, 1  ;;  %p187_p8 = scmp.lt.s32.totalorder %s2541_s24, 3 }
   0xc   : > { %s3042_s7 = scalar_select %p2631_p5, 1, 0 }
   0xd   : > { %s3043_s8 = scalar_select %p2635_p6, 1, 0 }
   0xe   : > { %p3039_p9 = scmp.eq.s32.totalorder %s2614_s25, 0  ;;  %p2642_p10 = pnand %p1994_p7, %p187_p8 }
   0xf   : > { %s2543_s10 = smov [#allocation2]   ;;  %s2447_s15 = scalar_lea.hbm %s3037_s5, 1408 }
  0x10   : > { %s3044_s9 = scalar_select %p2642_p10, 1, 0 }
  0x11   : > { %s208_s11 = sshll.u32 %s2543_s10, 4  ;;  %p2337_p11 = pneg %p2642_p10  ;;  %s209_s11 = int_to_ptr.vmem [resolvable:$true] %s208_s11 }
  0x12   : > { %p2448_p13 = scmp.ne.s32.totalorder %s3037_s5, %s2447_s15  ;;  %p2454_p3 = scmp.lt.u32.totalorder %s2447_s15, %s3037_s5 }
  0x13   : > { %p2650_p12 = pnand %p3039_p9, %p2337_p11 }
  0x15   : > { %p2449_p0 = pneg %p2650_p12 }
  0x17   : > { %p2450_p1 = pnand %p2449_p0, %p2448_p13 }
  0x19   : > { %p2451_p2 = pneg %p2450_p1 }
  0x1b   : > { %p2456_p4 = pnand %p2454_p3, %p2451_p2 }
  0x1d   : > { %2459 = shalt.err (!%p2456_p4)
}
  0x1e   : > { %s2460_s20 = scalar_lea.vmem %s209_s11, 1408  ;;  %p2468_p9 = scmp.lt.s32.totalorder %s209_s11, %s209_s11 }
  0x1f   : > { %p2461_p7 = scmp.ne.s32.totalorder %s209_s11, %s2460_s20  ;;  %p2469_p6 = scmp.lt.s32.totalorder %s2460_s20, %s2460_s20 }
  0x21   : > { %p2463_p8 = pnand %p2461_p7, %p2449_p0  ;;  %p2470_p5 = por %p2469_p6, %p2468_p9 }
  0x23   : > { %p2464_p11 = pneg %p2463_p8 }
  0x25   : > { %p2471_p10 = pnand %p2470_p5, %p2464_p11 }
  0x27   : > { %2474 = shalt.err (!%p2471_p10)
}
  0x28   : > { %s2544_s26 = smov 128   ;;  %s2545_s28 = smov 8  }
  0x29   : > { %2340 = dma.hbm_to_vmem [thread:$0]  (!%p2650_p12), %s3037_s5, 1408, %s209_s11, [#allocation3], %s2544_s26, %s2544_s26, %s2545_s28  }
  0x2a   : > { %p3046_p13 = scmp.ne.s32.totalorder %s3044_s9, 0 }
  0x2b   : > { %p3047_p1 = scmp.eq.s32.totalorder (!%p3046_p13), %s2614_s25, 0 }
  0x2c   : > { %237 = sbr.rel (%p3046_p13) target bundleno = 7019 (0x1b6b), region = 44 }
  0x33   : > { %2520 = dma.done.wait (%p3047_p1), [#allocation3], 1408   ;;  %p3048_p0 = pmov %p3047_p1 }
  0x34   : > { %p268_p5 = scmp.lt.s32.totalorder %s2614_s25, 1  ;;  %v2546_v0 = vmov 0   ;;  %v2547_v1 = vmov 0.0|0.0   ;;  %v2548_v2 = vmov 0.0   ;;  %v285_v4 = vld [vmem:[%s3034_s2] sm:$0xff]  ;;  %v286_v5 = vld [vmem:[%s3034_s2 + $0x8] sm:$0xff]  ;;  %v277_v23 = vlaneseq }
  0x35   : > { %2522 = vsyncadd (%p3048_p0), [#allocation3], 4294965888  ;;  %2394 = vset.pattern.permute.xlu0 %v2546_v0  ;;  %2301 = vmatprep.subr.bf16.mxu0 %v2547_v1  ;;  %v2302_v6 = vpack.c.bf16 %v286_v5, %v285_v4  ;;  %v287_v7 = vld [vmem:[%s3034_s2 + $0x10] sm:$0xff]  ;;  %v288_v8 = vld [vmem:[%s3034_s2 + $0x18] sm:$0xff]  ;;  %vm2549_vm0 = vmmov 0   ;;  %vm304_vm1 = vcmask 1043456  }
  0x36   : > { %s2679_s12 = scalar_select %p268_p5, %s2614_s25, 1  ;;  %2167 = vmatprep.subr.bf16.mxu1 %v2548_v2  ;;  %2164 = vmatprep.mubr.msk.f32.mxu0 %vm2549_vm0, %v2548_v2  ;;  %v2305_v9 = vpack.c.bf16 %v288_v8, %v287_v7  ;;  %v289_v10 = vld [vmem:[%s3034_s2 + $0x20] sm:$0xff]  ;;  %v290_v11 = vld [vmem:[%s3034_s2 + $0x28] sm:$0xff]  ;;  %v291_v12 = vld [vmem:[%s3034_s2 + $0x30] sm:$0xff]  ;;  %v278_v24 = vand.u32 127, %v277_v23  ;;  %vm300_vm2 = vcmask 818176  }
  0x37   : > { %2171 = vmatprep.mubr.msk.bf16.mxu1 %vm2549_vm0, %v2548_v2  ;;  %2303 = vmatpush3.bf16.msra.mxu0 %v2302_v6  ;;  %v292_v13 = vld [vmem:[%s3034_s2 + $0x38] sm:$0xff]  ;;  %v2308_v14 = vpack.c.bf16 %v290_v11, %v289_v10  ;;  %v293_v15 = vld [vmem:[%s3034_s2 + $0x40] sm:$0xff]  ;;  %v294_v16 = vld [vmem:[%s3034_s2 + $0x48] sm:$0xff]  ;;  %vm378_vm4 = vcmask 261120   ;;  %v394_v37 = vshrl.u32 %v277_v23, 7  ;;  %s2550_s13 = smov 96  }
  0x38   : > { %s1999_s9 = sshll.u32 %s2679_s12, 3  ;;  %2304 = vmatprep.subr.bf16.mxu0 %v2547_v1  ;;  %v2311_v17 = vpack.c.bf16 %v292_v13, %v291_v12  ;;  %v2314_v18 = vpack.c.bf16 %v294_v16, %v293_v15  ;;  %v295_v19 = vld [vmem:[%s3034_s2 + $0x50] sm:$0xff]  ;;  %v296_v20 = vld [vmem:[%s3034_s2 + $0x58] sm:$0xff]  ;;  %v297_v22 = vld [vmem:[%s3034_s2 + $0x60] sm:$0xf]  ;;  %s2551_s20 = smov 64  }
  0x39   : > { %s271_s14 = scalar_lea.vmem %s3032_s0, %s1999_s9  ;;  %v2317_v21 = vpack.c.bf16 %v296_v20, %v295_v19  ;;  %v298_v27 = vld [vmem:[#allocation2] sm:$0xff]  ;;  %v395_v38 = vsub.s32 0, %v394_v37  ;;  %v2741_v39 = vld [vmem:[#allocation2 + $0x50] sm:$0x1]  ;;  %v2755_v42 = vld [vmem:[%s3035_s3 + $0x8] sm:$0xff]   ;;  %vm486_vm5 = vcmask 130048   ;;  %s274_s29 = scalar_lea.vmem %s3033_s1, %s2679_s12 }
  0x3a   : > { %v276_v3 = vld [vmem:[%s271_s14] sm:$0xff]  ;;  %vm569_vm6 = vcmask 64512   ;;  %s2552_s10 = smov 112   ;;  %s2553_s12 = smov 80   ;;  %vm1004_vm7 = vcmask 523264   ;;  %vm1891_vm8 = vcmask 1040384  }
  0x3b   : > { %280 = vperm.xlu0 %2394, %v276_v3   ;;  %2306 = vmatpush3.bf16.msra.mxu0 %v2305_v9  ;;  %v396_v40 = vrot.slane %v2741_v39, %v395_v38  ;;  %v2748_v41 = vld [vmem:[%s3035_s3] sm:$0xff]   ;;  %s2554_s9 = smov 48   ;;  %s2555_s11 = smov 32  }
  0x3c   : > { %2307 = vmatprep.subr.bf16.mxu0 %v2547_v1  ;;  %2168 = vmatpush3.bf16.msra.mxu1 %v2748_v41  ;;  %v2769_v52 = vld [vmem:[%s3036_s4] ss:$0 sm:$0xff]  ;;  %s2556_s14 = smov 16   ;;  %p3049_p9 = scmp.ne.s32.totalorder %s3042_s7, 0 }
  0x3d   : > { %2169 = vmatprep.subr.bf16.mxu1 %v2548_v2  ;;  %v2784_v61 = vld [vmem:[%s274_s29] ss:$0 sm:$0xff] }
  0x3f   : > { %2309 = vmatpush3.bf16.msra.mxu0 %v2308_v14 }
  0x40   : > { %2310 = vmatprep.subr.bf16.mxu0 %v2547_v1  ;;  %2170 = vmatpush3.bf16.msra.mxu1 %v2755_v42 }
  0x41   : > { %2175 = vmatprep.subr.mxu1 %v2548_v2 }
  0x43   : > { %2312 = vmatpush3.bf16.msra.mxu0 %v2311_v17 }
  0x44   : > { %2313 = vmatprep.subr.bf16.mxu0 %v2547_v1 }
  0x47   : > { %2315 = vmatpush3.bf16.msra.mxu0 %v2314_v18 }
  0x48   : > { %2316 = vmatprep.subr.bf16.mxu0 %v2547_v1 }
  0x4b   : > { %2318 = vmatpush3.bf16.msra.mxu0 %v2317_v21 }
  0x4c   : > { %2162 = vmatprep.subr.mxu0 %v2548_v2 }
  0x4f   : > { %2163 = vmatpush3.msk.msra.mxu0 %vm304_vm1, %v297_v22 }
  0x50   : > { %2195 = vmatprep.subr.bf16.mxu0 %v2548_v2 }
  0xba   : > { %v281_v25 = vpop.permute.xlu0 %280 }
  0xbb   : > { %vm282_vm3 = vcmp.eq.s32.totalorder %v278_v24, %v281_v25 }
  0xbc   : > { %v2000_v26 = vsel %vm282_vm3, 1.0, %v2548_v2 }
  0xbd   : > { %2165 = vmatmul.mubr.msk.f32.vlgmr.msra.gmra.mrb[0].mxu0 %vm300_vm2, %v2000_v26 }
  0xbe   : > { %2199 = vmatprep.mubr.msk.bf16.mxu0 %vm2549_vm0, %v2548_v2 }
 0x190   : > { %v374_v28 = vpop.f32.mrb[0].mxu0 }
 0x191   : > { %v375_v29 = vadd.f32 %v374_v28, %v298_v27  ;;  %v2166_v30 = vpop.f32.mrb[1].mxu0 }
 0x193   : > { %v379_v31 = vsel %vm378_vm4, %v375_v29, 0.0 }
 0x194   : > { %380 = vadd.xlane.f32.xlu0 %v379_v31 }
 0x221   : > { %v381_v32 = vpop.xlane.xlu0 %380 }
 0x222   : > { %v383_v33 = vmul.f32 0.03125, %v381_v32 }
 0x224   : > { %v384_v34 = vsub.f32 %v375_v29, %v383_v33 }
 0x226   : > { %v385_v35 = vmul.f32 %v384_v34, %v384_v34 }
 0x228   : > { %v386_v36 = vsel %vm378_vm4, %v385_v35, 0.0 }
 0x229   : > { %387 = vadd.xlane.f32.xlu1 %v386_v36 }
 0x23a   : > { %399 = vrot.lane.b32.xlu1 %v396_v40, %s2550_s13 }
 0x2b6   : > { %v388_v43 = vpop.xlane.xlu1 %387 }
 0x2b7   : > { %v389_v44 = vmul.f32 0.03125, %v388_v43 }
 0x2b9   : > { %v390_v45 = vadd.f32 1e-12, %v389_v44 }
 0x2ba   : > { %v400_v48 = vpop.permute.xlu1 %399 }
 0x2bb   : > { %2411 = vrsqrt.f32 %v390_v45 }
 0x2c5   : > { %v2412_v46 = vpop.eup %2411 }
 0x2c6   : > { %v392_v47 = vmul.f32 %v2412_v46, %v384_v34  ;;  %v2015_v46 = vld [vmem:[%s3036_s4 + $0x1] ss:$0 sm:$0xff] }
 0x2c8   : > { %v397_v49 = vmul.f32 %v396_v40, %v392_v47 }
 0x2ca   : > { %v2759_v50 = vadd.f32 %v400_v48, %v397_v49 }
 0x2cc   : > { %v423_v51 = vpack.c.bf16 %v2759_v50, %v2759_v50 }
 0x2ce   : > { %2172 = vmatmul.mubr.msk.bf16.vlgmr.msra.gmra.mrb[0].mxu1 %vm378_vm4, %v423_v51 }
 0x2cf   : > { %2177 = vmatprep.mubr.msk.f32.mxu1 %vm2549_vm0, %v2548_v2 }
 0x3a1   : > { %v477_v53 = vpop.f32.mrb[0].mxu1 }
 0x3a2   : > { %v478_v54 = vadd.f32 %v2769_v52, %v477_v53  ;;  %v2173_v55 = vpop.f32.mrb[1].mxu1  ;;  %v2398_v53 = vld [vmem:[%s3035_s3 + $0x18] sm:$0xff]  }
 0x3a3   : > { %v480_v56 = vpop.f32.mrb[2].mxu1 }
 0x3a4   : > { %581 = vrot.lane.b32.xlu0 %v478_v54, %s2551_s20  ;;  %484 = vrot.lane.b32.xlu1 %v478_v54, %s2550_s13  ;;  %v2174_v57 = vpop.f32.mrb[3].mxu1 }
 0x416   : > { %v485_v58 = vpop.permute.xlu1 %484  ;;  %v582_v59 = vpop.permute.xlu0 %581 }
 0x417   : > { %2176 = vmatpush3.xpose.msk.msra.mxu1 %vm486_vm5, %v485_v58 }
 0x418   : > { %2180 = vmatprep.subr.mxu1 %v2548_v2 }
 0x41a   : > { %2178 = vmatmul.mubr.msk.f32.vlgmr.msra.gmra.mrb[4].mxu1 %vm486_vm5, %v478_v54 }
 0x41b   : > { %2181 = vmatpush3.msra.mxu1 %v582_v59  ;;  %2182 = vmatprep.mubr.msk.f32.mxu1 %vm2549_vm0, %v2548_v2 }
 0x41c   : > { %2185 = vmatprep.subr.mxu1 %v2548_v2 }
 0x4ed   : > { %v557_v60 = vpop.f32.mrb[4].mxu1 }
 0x4ee   : > { %v561_v62 = vmul.f32 0.25, %v557_v60  ;;  %v2179_v63 = vpop.f32.mrb[5].mxu1 }
 0x4f0   : > { %v568_v0 = vadd.f32 %v2784_v61, %v561_v62 }
 0x4f2   : > { %v570_v3 = vsel %vm569_vm6, %v568_v0, -inf }
 0x4f3   : > { %571 = vmax.xlane.f32.xlu1 %v570_v3  ;;  %v2400_v3 = vld [vmem:[%s3035_s3 + $0x28] sm:$0xff]  }
 0x504   : > { %657 = vrot.lane.b32.xlu1 %v478_v54, %s2552_s10 }
 0x580   : > { %v572_v4 = vpop.xlane.xlu1 %571 }
 0x581   : > { %v573_v5 = vsub.f32 %v568_v0, %v572_v4  ;;  %v2399_v0 = vld [vmem:[%s3035_s3 + $0x20] sm:$0xff]   ;;  %v2401_v4 = vld [vmem:[%s3035_s3 + $0x30] sm:$0xff]  }
 0x583   : > { %v574_v6 = vmul.f32 1.442695, %v573_v5  ;;  %v2402_v5 = vld [vmem:[%s3035_s3 + $0x38] sm:$0xff]  }
 0x584   : > { %v658_v13 = vpop.permute.xlu1 %657 }
 0x585   : > { %2413 = vpow2.f32 %v574_v6 }
 0x58f   : > { %v2414_v7 = vpop.eup %2413 }
 0x590   : > { %v576_v8 = vsel %vm569_vm6, %v2414_v7, 0.0 }
 0x591   : > { %577 = vadd.xlane.f32.xlu0 %v576_v8 }
 0x5a7   : > { %659 = vrot.lane.b32.xlu0 %v478_v54, %s2553_s12 }
 0x61e   : > { %v578_v9 = vpop.xlane.xlu0 %577 }
 0x61f   : > { %2415 = vrcp.f32 %v578_v9 }
 0x622   : > { %v660_v12 = vpop.permute.xlu0 %659 }
 0x629   : > { %v2416_v10 = vpop.eup %2415 }
 0x62a   : > { %v580_v11 = vmul.f32 %v2416_v10, %v2414_v7 }
 0x62c   : > { %2183 = vmatmul.mubr.msk.f32.vlgmr.msra.gmra.mrb[6].mxu1 %vm569_vm6, %v580_v11 }
 0x62d   : > { %2186 = vmatpush3.xpose.msk.msra.mxu1 %vm486_vm5, %v660_v12  ;;  %2187 = vmatprep.mubr.msk.f32.mxu1 %vm2549_vm0, %v2548_v2 }
 0x62e   : > { %2190 = vmatprep.subr.mxu1 %v2548_v2 }
 0x630   : > { %2188 = vmatmul.mubr.msk.f32.vlgmr.msra.gmra.mrb[8].mxu1 %vm486_vm5, %v658_v13 }
 0x631   : > { %2192 = vmatprep.mubr.msk.f32.mxu1 %vm2549_vm0, %v2548_v2 }
 0x6ff   : > { %v653_v14 = vpop.f32.mrb[6].mxu1 }
 0x700   : > { %v2184_v15 = vpop.f32.mrb[7].mxu1 }
 0x703   : > { %v731_v16 = vpop.f32.mrb[8].mxu1 }
 0x704   : > { %v735_v17 = vmul.f32 0.25, %v731_v16  ;;  %v2189_v18 = vpop.f32.mrb[9].mxu1 }
 0x706   : > { %v736_v19 = vadd.f32 %v2784_v61, %v735_v17 }
 0x708   : > { %v737_v20 = vsel %vm569_vm6, %v736_v19, -inf }
 0x709   : > { %738 = vmax.xlane.f32.xlu0 %v737_v20 }
 0x71f   : > { %748 = vrot.lane.b32.xlu0 %v478_v54, %s2554_s9 }
 0x796   : > { %v739_v21 = vpop.xlane.xlu0 %738 }
 0x797   : > { %v740_v22 = vsub.f32 %v736_v19, %v739_v21 }
 0x799   : > { %v741_v23 = vmul.f32 1.442695, %v740_v22  ;;  %v2019_v22 = vld [vmem:[%s3036_s4 + $0x2] ss:$0 sm:$0xff] }
 0x79a   : > { %v749_v24 = vpop.permute.xlu0 %748 }
 0x79b   : > { %2417 = vpow2.f32 %v741_v23  ;;  %2191 = vmatpush3.msra.mxu1 %v749_v24 }
 0x79c   : > { %2203 = vmatprep.subr.bf16.mxu1 %v2548_v2 }
 0x7a5   : > { %v2418_v25 = vpop.eup %2417 }
 0x7a6   : > { %v743_v26 = vsel %vm569_vm6, %v2418_v25, 0.0 }
 0x7a7   : > { %744 = vadd.xlane.f32.xlu1 %v743_v26 }
 0x7b8   : > { %830 = vrot.lane.b32.xlu1 %v2748_v41, %s2555_s11 }
 0x834   : > { %v745_v27 = vpop.xlane.xlu1 %744 }
 0x835   : > { %2419 = vrcp.f32 %v745_v27 }
 0x838   : > { %v831_v30 = vpop.permute.xlu1 %830 }
 0x839   : > { %2196 = vmatpush3.bf16.msra.mxu0 %v831_v30 }
 0x83a   : > { %2197 = vmatprep.subr.bf16.mxu0 %v2548_v2 }
 0x83f   : > { %v2420_v28 = vpop.eup %2419 }
 0x840   : > { %v747_v29 = vmul.f32 %v2420_v28, %v2418_v25 }
 0x842   : > { %2193 = vmatmul.mubr.msk.f32.vlgmr.msra.gmra.mrb[10].mxu1 %vm569_vm6, %v747_v29 }
 0x843   : > { %2207 = vmatprep.mubr.msk.bf16.mxu1 %vm2549_vm0, %v2548_v2 }
 0x915   : > { %v820_v31 = vpop.f32.mrb[10].mxu1 }
 0x916   : > { %825 = vrot.lane.b32.xlu0 %v820_v31, %s2556_s14  ;;  %v2194_v32 = vpop.f32.mrb[11].mxu1 }
 0x91a   : > { %832 = vrot.lane.b32.xlu0 %v2755_v42, %s2555_s11 }
 0x91e   : > { %837 = vrot.lane.b32.xlu0 %v2769_v52, %s2555_s11 }
 0x988   : > { %v826_v33 = vpop.permute.xlu0 %825 }
 0x989   : > { %v828_v34 = vsel %vm486_vm5, %v653_v14, %v826_v33 }
 0x98a   : > { %v829_v36 = vpack.c.bf16 %v828_v34, %v828_v34 }
 0x98c   : > { %v833_v35 = vpop.permute.xlu0 %832 }
 0x98d   : > { %2198 = vmatpush3.bf16.msra.mxu0 %v833_v35  ;;  %v2868_v35 = vld [vmem:[%s3035_s3 + $0x40] sm:$0xff]  }
 0x98e   : > { %2211 = vmatprep.subr.bf16.mxu0 %v2548_v2 }
 0x990   : > { %2200 = vmatmul.mubr.msk.bf16.vlgmr.msra.gmra.mrb[4].mxu0 %vm378_vm4, %v829_v36  ;;  %v838_v37 = vpop.permute.xlu0 %837  ;;  %v2875_v36 = vld [vmem:[%s3035_s3 + $0x48] sm:$0xff]  }
 0x991   : > { %2219 = vmatprep.mubr.msk.bf16.mxu0 %vm2549_vm0, %v2548_v2  ;;  %2212 = vmatpush3.bf16.msra.mxu0 %v2399_v0 }
 0x992   : > { %2213 = vmatprep.subr.bf16.mxu0 %v2548_v2 }
 0x995   : > { %2214 = vmatpush3.bf16.msra.mxu0 %v2400_v3 }
 0x996   : > { %2215 = vmatprep.subr.bf16.mxu0 %v2548_v2 }
 0x999   : > { %2216 = vmatpush3.bf16.msra.mxu0 %v2401_v4 }
 0x99a   : > { %2217 = vmatprep.subr.bf16.mxu0 %v2548_v2 }
 0x99d   : > { %2218 = vmatpush3.bf16.msra.mxu0 %v2402_v5 }
 0x99e   : > { %2241 = vmatprep.subr.mxu0 %v2548_v2 }
 0xa63   : > { %v877_v38 = vpop.f32.mrb[4].mxu0 }
 0xa64   : > { %v878_v40 = vadd.f32 %v877_v38, %v838_v37  ;;  %v2201_v41 = vpop.f32.mrb[5].mxu0 }
 0xa65   : > { %v880_v42 = vpop.f32.mrb[6].mxu0 }
 0xa66   : > { %v2202_v43 = vpop.f32.mrb[7].mxu0  ;;  %v883_v44 = vadd.f32 %v878_v40, %v2759_v50  ;;  %v2397_v50 = vld [vmem:[%s3035_s3 + $0x10] sm:$0xff]  }
 0xa67   : > { %2204 = vmatpush3.bf16.msra.mxu1 %v2397_v50 }
 0xa68   : > { %v884_v45 = vsel %vm378_vm4, %v883_v44, 0.0  ;;  %2205 = vmatprep.subr.bf16.mxu1 %v2548_v2 }
 0xa69   : > { %885 = vadd.xlane.f32.xlu0 %v884_v45 }
 0xa6b   : > { %2206 = vmatpush3.bf16.msra.mxu1 %v2398_v53 }
 0xa6c   : > { %2223 = vmatprep.subr.bf16.mxu1 %v2548_v2 }
 0xa7f   : > { %903 = vrot.lane.b32.xlu0 %v2015_v46, %s2550_s13 }
 0xaf6   : > { %v886_v47 = vpop.xlane.xlu0 %885 }
 0xaf7   : > { %v887_v48 = vmul.f32 0.03125, %v886_v47 }
 0xaf9   : > { %v888_v49 = vsub.f32 %v883_v44, %v887_v48  ;;  %v2889_v48 = vld [vmem:[%s3036_s4 + $0x8] ss:$0 sm:$0xff] }
 0xafa   : > { %v904_v59 = vpop.permute.xlu0 %903 }
 0xafb   : > { %v889_v51 = vmul.f32 %v888_v49, %v888_v49 }
 0xafd   : > { %v890_v52 = vsel %vm378_vm4, %v889_v51, 0.0 }
 0xafe   : > { %891 = vadd.xlane.f32.xlu1 %v890_v52 }
 0xb0f   : > { %920 = vrot.lane.b32.xlu1 %v2015_v46, %s2551_s20 }
 0xb8b   : > { %v892_v54 = vpop.xlane.xlu1 %891 }
 0xb8c   : > { %v893_v55 = vmul.f32 0.03125, %v892_v54 }
 0xb8e   : > { %v894_v56 = vadd.f32 1e-12, %v893_v55 }
 0xb8f   : > { %v921_v6 = vpop.permute.xlu1 %920 }
 0xb90   : > { %2421 = vrsqrt.f32 %v894_v56 }
 0xb9a   : > { %v2422_v57 = vpop.eup %2421 }
 0xb9b   : > { %v896_v58 = vmul.f32 %v2422_v57, %v888_v49 }
 0xb9d   : > { %v901_v60 = vmul.f32 %v2015_v46, %v896_v58 }
 0xb9f   : > { %v906_v62 = vadd.f32 %v904_v59, %v901_v60 }
 0xba1   : > { %v907_v63 = vpack.c.bf16 %v906_v62, %v906_v62 }
 0xba3   : > { %2208 = vmatmul.mubr.msk.bf16.vlgmr.msra.gmra.mrb[12].mxu1 %vm378_vm4, %v907_v63 }
 0xba4   : > { %2227 = vmatprep.mubr.msk.bf16.mxu1 %vm2549_vm0, %v2548_v2  ;;  %2224 = vmatpush3.bf16.msra.mxu1 %v2868_v35 }
 0xba5   : > { %2225 = vmatprep.subr.bf16.mxu1 %v2548_v2 }
 0xba8   : > { %2226 = vmatpush3.bf16.msra.mxu1 %v2875_v36 }
 0xba9   : > { %2231 = vmatprep.subr.mxu1 %v2548_v2 }
 0xc76   : > { %v960_v7 = vpop.f32.mrb[12].mxu1 }
 0xc77   : > { %v961_v8 = vadd.f32 %v960_v7, %v921_v6  ;;  %v2209_v9 = vpop.f32.mrb[13].mxu1 }
 0xc78   : > { %v963_v10 = vpop.f32.mrb[14].mxu1 }
 0xc79   : > { %v966_v11 = vmul.f32 %v961_v8, %v961_v8  ;;  %v2210_v12 = vpop.f32.mrb[15].mxu1 }
 0xc7b   : > { %v967_v13 = vmul.f32 %v966_v11, %v961_v8 }
 0xc7d   : > { %v968_v14 = vmul.f32 0.044715, %v967_v13 }
 0xc7f   : > { %v969_v15 = vadd.f32 %v968_v14, %v961_v8 }
 0xc81   : > { %v970_v16 = vmul.f32 0.7978846, %v969_v15 }
 0xc83   : > { %2423 = vtanh.f32 %v970_v16 }
 0xc8d   : > { %v2424_v17 = vpop.eup %2423 }
 0xc8e   : > { %v972_v18 = vadd.f32 1.0, %v2424_v17 }
 0xc90   : > { %v973_v19 = vmul.f32 0.5, %v972_v18 }
 0xc92   : > { %v974_v20 = vmul.f32 %v973_v19, %v961_v8 }
 0xc94   : > { %v975_v21 = vpack.c.bf16 %v974_v20, %v974_v20 }
 0xc96   : > { %2220 = vmatmul.mubr.msk.bf16.vlgmr.msra.gmra.mrb[8].mxu0 %vm1004_vm7, %v975_v21 }
 0xc97   : > { %2243 = vmatprep.mubr.msk.f32.mxu0 %vm2549_vm0, %v2548_v2 }
 0xd69   : > { %v1042_v23 = vpop.f32.mrb[8].mxu0 }
 0xd6a   : > { %v1043_v24 = vadd.f32 %v2019_v22, %v1042_v23  ;;  %v2221_v25 = vpop.f32.mrb[9].mxu0 }
 0xd6b   : > { %v1045_v26 = vpop.f32.mrb[10].mxu0 }
 0xd6c   : > { %v2222_v27 = vpop.f32.mrb[11].mxu0  ;;  %v1048_v28 = vadd.f32 %v1043_v24, %v906_v62 }
 0xd6e   : > { %v1049_v29 = vsel %vm378_vm4, %v1048_v28, 0.0 }
 0xd6f   : > { %1050 = vadd.xlane.f32.xlu0 %v1049_v29 }
 0xd85   : > { %1063 = vrot.lane.b32.xlu0 %v2019_v22, %s2550_s13 }
 0xdfc   : > { %v1051_v30 = vpop.xlane.xlu0 %1050 }
 0xdfd   : > { %v1052_v31 = vmul.f32 0.03125, %v1051_v30 }
 0xdff   : > { %v1053_v32 = vsub.f32 %v1048_v28, %v1052_v31 }
 0xe00   : > { %v1064_v42 = vpop.permute.xlu0 %1063 }
 0xe01   : > { %v1054_v33 = vmul.f32 %v1053_v32, %v1053_v32 }
 0xe03   : > { %v1055_v34 = vsel %vm378_vm4, %v1054_v33, 0.0 }
 0xe04   : > { %1056 = vadd.xlane.f32.xlu1 %v1055_v34 }
 0xe15   : > { %1067 = vrot.lane.b32.xlu1 %v2019_v22, %s2551_s20 }
 0xe91   : > { %v1057_v37 = vpop.xlane.xlu1 %1056 }
 0xe92   : > { %v1058_v38 = vmul.f32 0.03125, %v1057_v37 }
 0xe94   : > { %v1059_v40 = vadd.f32 1e-12, %v1058_v38 }
 0xe95   : > { %v1068_v44 = vpop.permute.xlu1 %1067 }
 0xe96   : > { %2425 = vrsqrt.f32 %v1059_v40 }
 0xea0   : > { %v2426_v41 = vpop.eup %2425 }
 0xea1   : > { %v1061_v43 = vmul.f32 %v2426_v41, %v1053_v32  ;;  %v2055_v41 = vld [vmem:[%s3036_s4 + $0x9] ss:$0 sm:$0xff] }
 0xea3   : > { %v1066_v45 = vmul.f32 %v1064_v42, %v1061_v43 }
 0xea5   : > { %v2879_v46 = vadd.f32 %v1068_v44, %v1066_v45 }
 0xea7   : > { %v1092_v47 = vpack.c.bf16 %v2879_v46, %v2879_v46 }
 0xea9   : > { %2228 = vmatmul.mubr.msk.bf16.vlgmr.msra.gmra.mrb[16].mxu1 %vm378_vm4, %v1092_v47 }
 0xeaa   : > { %2233 = vmatprep.mubr.msk.f32.mxu1 %vm2549_vm0, %v2548_v2 }
 0xf7c   : > { %v1146_v49 = vpop.f32.mrb[16].mxu1 }
 0xf7d   : > { %v1147_v51 = vadd.f32 %v2889_v48, %v1146_v49  ;;  %v2229_v52 = vpop.f32.mrb[17].mxu1 }
 0xf7e   : > { %v1149_v50 = vpop.f32.mrb[18].mxu1 }
 0xf7f   : > { %1320 = vrot.lane.b32.xlu1 %v1147_v51, %s2553_s12  ;;  %1153 = vrot.lane.b32.xlu0 %v1147_v51, %s2550_s13  ;;  %v2230_v53 = vpop.f32.mrb[19].mxu1 }
 0xf83   : > { %1318 = vrot.lane.b32.xlu0 %v1147_v51, %s2552_s10 }
 0xff1   : > { %v1321_v54 = vpop.permute.xlu1 %1320  ;;  %v1154_v55 = vpop.permute.xlu0 %1153 }
 0xff2   : > { %2232 = vmatpush3.xpose.msk.msra.mxu1 %vm486_vm5, %v1154_v55  ;;  %2242 = vmatpush3.xpose.msk.msra.mxu0 %vm486_vm5, %v1321_v54 }
 0xff3   : > { %2236 = vmatprep.subr.mxu1 %v2548_v2  ;;  %2251 = vmatprep.subr.bf16.mxu0 %v2548_v2 }
 0xff5   : > { %2234 = vmatmul.mubr.msk.f32.vlgmr.msra.gmra.mrb[20].mxu1 %vm486_vm5, %v1147_v51  ;;  %v1319_v56 = vpop.permute.xlu0 %1318 }
 0xff6   : > { %2244 = vmatmul.mubr.msk.f32.vlgmr.msra.gmra.mrb[2].mxu0 %vm486_vm5, %v1319_v56  ;;  %2238 = vmatprep.mubr.msk.f32.mxu1 %vm2549_vm0, %v2548_v2 }
 0xff7   : > { %2255 = vmatprep.mubr.msk.bf16.mxu0 %vm2549_vm0, %v2548_v2 }
0x10c8   : > { %v1225_v57 = vpop.f32.mrb[20].mxu1 }
0x10c9   : > { %v1229_v58 = vmul.f32 0.25, %v1225_v57  ;;  %v2235_v59 = vpop.f32.mrb[21].mxu1  ;;  %v1392_v60 = vpop.f32.mrb[2].mxu0 }
0x10ca   : > { %v1396_v62 = vmul.f32 0.25, %v1392_v60  ;;  %v2245_v63 = vpop.f32.mrb[3].mxu0  ;;  %v2408_v59 = vld [vmem:[%s3035_s3 + $0x68] sm:$0xff]   ;;  %v2409_v60 = vld [vmem:[%s3035_s3 + $0x70] sm:$0xff]  }
0x10cb   : > { %v1230_v0 = vadd.f32 %v2784_v61, %v1229_v58  ;;  %v2407_v58 = vld [vmem:[%s3035_s3 + $0x60] sm:$0xff]  }
0x10cc   : > { %v1397_v3 = vadd.f32 %v2784_v61, %v1396_v62  ;;  %v2410_v62 = vld [vmem:[%s3035_s3 + $0x78] sm:$0xff]  }
0x10cd   : > { %v1231_v4 = vsel %vm569_vm6, %v1230_v0, -inf }
0x10ce   : > { %1232 = vmax.xlane.f32.xlu1 %v1231_v4  ;;  %v1398_v5 = vsel %vm569_vm6, %v1397_v3, -inf }
0x10cf   : > { %1399 = vmax.xlane.f32.xlu0 %v1398_v5 }
0x115b   : > { %v1233_v6 = vpop.xlane.xlu1 %1232 }
0x115c   : > { %v1234_v7 = vsub.f32 %v1230_v0, %v1233_v6  ;;  %v1400_v8 = vpop.xlane.xlu0 %1399 }
0x115d   : > { %v1401_v9 = vsub.f32 %v1397_v3, %v1400_v8 }
0x115e   : > { %v1235_v10 = vmul.f32 1.442695, %v1234_v7 }
0x115f   : > { %v1402_v11 = vmul.f32 1.442695, %v1401_v9 }
0x1160   : > { %2427 = vpow2.f32 %v1235_v10 }
0x1161   : > { %2429 = vpow2.f32 %v1402_v11 }
0x116a   : > { %v2428_v12 = vpop.eup %2427 }
0x116b   : > { %v2430_v13 = vpop.eup %2429  ;;  %v1237_v14 = vsel %vm569_vm6, %v2428_v12, 0.0 }
0x116c   : > { %1238 = vadd.xlane.f32.xlu0 %v1237_v14  ;;  %v1404_v61 = vsel %vm569_vm6, %v2430_v13, 0.0 }
0x116d   : > { %1405 = vadd.xlane.f32.xlu1 %v1404_v61 }
0x117e   : > { %1409 = vrot.lane.b32.xlu1 %v1147_v51, %s2554_s9 }
0x1182   : > { %1242 = vrot.lane.b32.xlu0 %v1147_v51, %s2551_s20  ;;  %1491 = vrot.lane.b32.xlu1 %v2868_v35, %s2555_s11 }
0x1186   : > { %1493 = vrot.lane.b32.xlu1 %v2875_v36, %s2555_s11 }
0x11f9   : > { %v1239_v15 = vpop.xlane.xlu0 %1238 }
0x11fa   : > { %2431 = vrcp.f32 %v1239_v15  ;;  %v1406_v16 = vpop.xlane.xlu1 %1405 }
0x11fb   : > { %2433 = vrcp.f32 %v1406_v16  ;;  %v2059_v16 = vld [vmem:[%s3036_s4 + $0xa] ss:$0 sm:$0xff] }
0x11fd   : > { %v1243_v17 = vpop.permute.xlu0 %1242 }
0x11fe   : > { %2237 = vmatpush3.msra.mxu1 %v1243_v17  ;;  %v1410_v21 = vpop.permute.xlu1 %1409 }
0x11ff   : > { %2246 = vmatprep.subr.mxu1 %v2548_v2 }
0x1202   : > { %v1492_v23 = vpop.permute.xlu1 %1491 }
0x1203   : > { %2252 = vmatpush3.bf16.msra.mxu0 %v1492_v23 }
0x1204   : > { %v2432_v18 = vpop.eup %2431  ;;  %2253 = vmatprep.subr.bf16.mxu0 %v2548_v2 }
0x1205   : > { %v1241_v19 = vmul.f32 %v2432_v18, %v2428_v12  ;;  %v2434_v20 = vpop.eup %2433 }
0x1206   : > { %v1408_v22 = vmul.f32 %v2434_v20, %v2430_v13  ;;  %v1494_v24 = vpop.permute.xlu1 %1493 }
0x1207   : > { %2239 = vmatmul.mubr.msk.f32.vlgmr.msra.gmra.mrb[22].mxu1 %vm569_vm6, %v1241_v19  ;;  %2254 = vmatpush3.bf16.msra.mxu0 %v1494_v24 }
0x1208   : > { %2247 = vmatpush3.msra.mxu1 %v1410_v21  ;;  %2248 = vmatprep.mubr.msk.f32.mxu1 %vm2549_vm0, %v2548_v2 }
0x1209   : > { %2259 = vmatprep.subr.bf16.mxu1 %v2548_v2  ;;  %2267 = vmatprep.subr.bf16.mxu0 %v2548_v2 }
0x120b   : > { %2249 = vmatmul.mubr.msk.f32.vlgmr.msra.gmra.mrb[24].mxu1 %vm569_vm6, %v1408_v22 }
0x120c   : > { %2263 = vmatprep.mubr.msk.bf16.mxu1 %vm2549_vm0, %v2548_v2 }
0x12da   : > { %v1314_v25 = vpop.f32.mrb[22].mxu1 }
0x12db   : > { %v2240_v26 = vpop.f32.mrb[23].mxu1 }
0x12de   : > { %v1481_v27 = vpop.f32.mrb[24].mxu1 }
0x12df   : > { %1486 = vrot.lane.b32.xlu0 %v1481_v27, %s2556_s14  ;;  %v2250_v28 = vpop.f32.mrb[25].mxu1 }
0x12e3   : > { %1498 = vrot.lane.b32.xlu0 %v2889_v48, %s2555_s11  ;;  %v2406_v48 = vld [vmem:[%s3035_s3 + $0x58] sm:$0xff]  }
0x1351   : > { %v1487_v29 = vpop.permute.xlu0 %1486 }
0x1352   : > { %v1489_v30 = vsel %vm486_vm5, %v1314_v25, %v1487_v29  ;;  %v1731_v29 = vld [vmem:[#allocation2 + $0x10] sm:$0xff] }
0x1353   : > { %v1490_v31 = vpack.c.bf16 %v1489_v30, %v1489_v30  ;;  %v1732_v30 = vld [vmem:[#allocation2 + $0x18] sm:$0xff] }
0x1355   : > { %2256 = vmatmul.mubr.msk.bf16.vlgmr.msra.gmra.mrb[12].mxu0 %vm378_vm4, %v1490_v31  ;;  %v1499_v32 = vpop.permute.xlu0 %1498  ;;  %v2320_v31 = vpack.c.bf16 %v1732_v30, %v1731_v29 }
0x1356   : > { %2275 = vmatprep.mubr.msk.bf16.mxu0 %vm2549_vm0, %v2548_v2  ;;  %2268 = vmatpush3.bf16.msra.mxu0 %v2407_v58 }
0x1357   : > { %2269 = vmatprep.subr.bf16.mxu0 %v2548_v2 }
0x135a   : > { %2270 = vmatpush3.bf16.msra.mxu0 %v2408_v59 }
0x135b   : > { %2271 = vmatprep.subr.bf16.mxu0 %v2548_v2 }
0x135e   : > { %2272 = vmatpush3.bf16.msra.mxu0 %v2409_v60 }
0x135f   : > { %2273 = vmatprep.subr.bf16.mxu0 %v2548_v2 }
0x1362   : > { %2274 = vmatpush3.bf16.msra.mxu0 %v2410_v62 }
0x1428   : > { %v1538_v33 = vpop.f32.mrb[12].mxu0 }
0x1429   : > { %v1539_v34 = vadd.f32 %v1538_v33, %v1499_v32  ;;  %v2257_v35 = vpop.f32.mrb[13].mxu0  ;;  %v1733_v32 = vld [vmem:[#allocation2 + $0x20] sm:$0xff]  ;;  %v1734_v33 = vld [vmem:[#allocation2 + $0x28] sm:$0xff] }
0x142a   : > { %v1541_v36 = vpop.f32.mrb[14].mxu0 }
0x142b   : > { %v2258_v37 = vpop.f32.mrb[15].mxu0  ;;  %v1544_v38 = vadd.f32 %v1539_v34, %v2879_v46  ;;  %v2405_v46 = vld [vmem:[%s3035_s3 + $0x50] sm:$0xff]   ;;  %v2323_v34 = vpack.c.bf16 %v1734_v33, %v1733_v32 }
0x142c   : > { %2260 = vmatpush3.bf16.msra.mxu1 %v2405_v46 }
0x142d   : > { %v1545_v40 = vsel %vm378_vm4, %v1544_v38, 0.0  ;;  %2261 = vmatprep.subr.bf16.mxu1 %v2548_v2 }
0x142e   : > { %1546 = vadd.xlane.f32.xlu1 %v1545_v40 }
0x1430   : > { %2262 = vmatpush3.bf16.msra.mxu1 %v2406_v48  ;;  %v1738_v48 = vld [vmem:[#allocation2 + $0x48] sm:$0xff] }
0x1431   : > { %2319 = vmatprep.subr.bf16.mxu1 %v2547_v1 }
0x143f   : > { %1581 = vrot.lane.b32.xlu1 %v2055_v41, %s2551_s20 }
0x14bb   : > { %v1547_v42 = vpop.xlane.xlu1 %1546 }
0x14bc   : > { %v1548_v43 = vmul.f32 0.03125, %v1547_v42 }
0x14be   : > { %v1549_v44 = vsub.f32 %v1544_v38, %v1548_v43 }
0x14bf   : > { %v1582_v63 = vpop.permute.xlu1 %1581 }
0x14c0   : > { %v1550_v45 = vmul.f32 %v1549_v44, %v1549_v44 }
0x14c2   : > { %v1551_v47 = vsel %vm378_vm4, %v1550_v45, 0.0  ;;  %v1736_v45 = vld [vmem:[#allocation2 + $0x38] sm:$0xff] }
0x14c3   : > { %1552 = vadd.xlane.f32.xlu0 %v1551_v47  ;;  %v1737_v47 = vld [vmem:[#allocation2 + $0x40] sm:$0xff] }
0x14d9   : > { %1564 = vrot.lane.b32.xlu0 %v2055_v41, %s2550_s13 }
0x1550   : > { %v1553_v49 = vpop.xlane.xlu0 %1552 }
0x1551   : > { %v1554_v51 = vmul.f32 0.03125, %v1553_v49  ;;  %v2329_v49 = vpack.c.bf16 %v1738_v48, %v1737_v47 }
0x1553   : > { %v1555_v52 = vadd.f32 1e-12, %v1554_v51 }
0x1554   : > { %v1565_v54 = vpop.permute.xlu0 %1564 }
0x1555   : > { %2435 = vrsqrt.f32 %v1555_v52 }
0x155f   : > { %v2436_v50 = vpop.eup %2435 }
0x1560   : > { %v1557_v53 = vmul.f32 %v2436_v50, %v1549_v44  ;;  %v1735_v44 = vld [vmem:[#allocation2 + $0x30] sm:$0xff] }
0x1561   : > { %v2326_v46 = vpack.c.bf16 %v1736_v45, %v1735_v44 }
0x1562   : > { %v1562_v55 = vmul.f32 %v2055_v41, %v1557_v53 }
0x1564   : > { %v1567_v56 = vadd.f32 %v1565_v54, %v1562_v55  ;;  %v1739_v55 = vld [vmem:[#allocation2 + $0x51] sm:$0x1] }
0x1566   : > { %v1568_v57 = vpack.c.bf16 %v1567_v56, %v1567_v56 }
0x1568   : > { %2264 = vmatmul.mubr.msk.bf16.vlgmr.msra.gmra.mrb[28].mxu1 %vm378_vm4, %v1568_v57 }
0x1569   : > { %2287 = vmatprep.mubr.msk.f32.mxu1 %vm2549_vm0, %v2548_v2  ;;  %2321 = vmatpush3.bf16.msra.mxu1 %v2320_v31 }
0x156a   : > { %2322 = vmatprep.subr.bf16.mxu1 %v2547_v1 }
0x156d   : > { %2324 = vmatpush3.bf16.msra.mxu1 %v2323_v34 }
0x156e   : > { %2325 = vmatprep.subr.bf16.mxu1 %v2547_v1 }
0x163b   : > { %v1621_v0 = vpop.f32.mrb[28].mxu1 }
0x163c   : > { %v1622_v3 = vadd.f32 %v1621_v0, %v1582_v63  ;;  %v2265_v4 = vpop.f32.mrb[29].mxu1 }
0x163d   : > { %v1624_v5 = vpop.f32.mrb[30].mxu1 }
0x163e   : > { %v1627_v6 = vmul.f32 %v1622_v3, %v1622_v3  ;;  %v2266_v7 = vpop.f32.mrb[31].mxu1 }
0x1640   : > { %v1628_v8 = vmul.f32 %v1627_v6, %v1622_v3 }
0x1642   : > { %v1629_v9 = vmul.f32 0.044715, %v1628_v8 }
0x1644   : > { %v1630_v10 = vadd.f32 %v1629_v9, %v1622_v3 }
0x1646   : > { %v1631_v11 = vmul.f32 0.7978846, %v1630_v10 }
0x1648   : > { %2437 = vtanh.f32 %v1631_v11 }
0x1652   : > { %v2438_v12 = vpop.eup %2437 }
0x1653   : > { %v1633_v13 = vadd.f32 1.0, %v2438_v12 }
0x1655   : > { %v1634_v14 = vmul.f32 0.5, %v1633_v13 }
0x1657   : > { %v1635_v61 = vmul.f32 %v1634_v14, %v1622_v3 }
0x1659   : > { %v1636_v15 = vpack.c.bf16 %v1635_v61, %v1635_v61 }
0x165b   : > { %2276 = vmatmul.mubr.msk.bf16.vlgmr.msra.gmra.mrb[16].mxu0 %vm1004_vm7, %v1636_v15 }
0x172e   : > { %v1702_v17 = vpop.f32.mrb[16].mxu0 }
0x172f   : > { %v1703_v18 = vadd.f32 %v2059_v16, %v1702_v17  ;;  %v2277_v19 = vpop.f32.mrb[17].mxu0 }
0x1730   : > { %v1705_v20 = vpop.f32.mrb[18].mxu0 }
0x1731   : > { %v2278_v21 = vpop.f32.mrb[19].mxu0  ;;  %v1708_v22 = vadd.f32 %v1703_v18, %v1567_v56 }
0x1733   : > { %v1709_v23 = vsel %vm378_vm4, %v1708_v22, 0.0 }
0x1734   : > { %1710 = vadd.xlane.f32.xlu1 %v1709_v23 }
0x1745   : > { %1727 = vrot.lane.b32.xlu1 %v2059_v16, %s2551_s20 }
0x1749   : > { %1741 = vrot.lane.b32.xlu1 %v2741_v39, %s2551_s20  ;;  %s2067_s20 = sshll.u32 %s2614_s25, 4  ;;  %s2557_s25 = smov [#allocation5]  }
0x174a   : > { %s2990_s15 = scalar_lea.hbm %s3038_s6, %s2067_s20  ;;  %s2479_s18 = sshll.u32 %s2557_s25, 4  ;;  %s2480_s18 = int_to_ptr.vmem [resolvable:$false] %s2479_s18 }
0x174b   : > { %s2481_s19 = scalar_lea.vmem %s2480_s18, 32 }
0x17c1   : > { %v1711_v24 = vpop.xlane.xlu1 %1710 }
0x17c2   : > { %v1712_v25 = vmul.f32 0.03125, %v1711_v24 }
0x17c4   : > { %v1713_v26 = vsub.f32 %v1708_v22, %v1712_v25 }
0x17c5   : > { %v1728_v41 = vpop.permute.xlu1 %1727 }
0x17c6   : > { %v1714_v27 = vmul.f32 %v1713_v26, %v1713_v26 }
0x17c8   : > { %v1715_v28 = vsel %vm378_vm4, %v1714_v27, 0.0 }
0x17c9   : > { %1716 = vadd.xlane.f32.xlu0 %v1715_v28  ;;  %v1742_v51 = vpop.permute.xlu1 %1741 }
0x17df   : > { %1723 = vrot.lane.b32.xlu0 %v2059_v16, %s2550_s13  ;;  %s266_s13 = sand.u32 1, %s2533_s22  }
0x17e0   : > { %s267_s11 = scalar_lea.vmem [#allocation5], %s266_s13  ;;  %s1905_s16 = scalar_lea.sflag [#allocation4], %s266_s13 }
0x17e1   : > { %s1917_s14 = sshll.u32 %s267_s11, 4  ;;  %s2992_s14 = int_to_ptr.vmem [resolvable:$true] %s1917_s14 }
0x17e2   : > { %s2475_s17 = scalar_lea.vmem %s2992_s14, 16  ;;  %p2482_p2 = scmp.lt.s32.totalorder %s2992_s14, %s2480_s18 }
0x17e3   : > { %p2476_p6 = scmp.ne.s32.totalorder %s2992_s14, %s2475_s17  ;;  %p2483_p3 = scmp.lt.s32.totalorder %s2481_s19, %s2475_s17 }
0x17e5   : > { %p2477_p10 = pnand %p2476_p6, %p3049_p9  ;;  %p2484_p4 = por %p2483_p3, %p2482_p2 }
0x17e7   : > { %p2478_p12 = pneg %p2477_p10 }
0x17e9   : > { %p2485_p7 = pnand %p2484_p4, %p2478_p12 }
0x1856   : > { %v1717_v39 = vpop.xlane.xlu0 %1716 }
0x1857   : > { %v1718_v35 = vmul.f32 0.03125, %v1717_v39 }
0x1859   : > { %v1719_v36 = vadd.f32 1e-12, %v1718_v35 }
0x185a   : > { %v1724_v38 = vpop.permute.xlu0 %1723 }
0x185b   : > { %2439 = vrsqrt.f32 %v1719_v36 }
0x1865   : > { %v2440_v37 = vpop.eup %2439 }
0x1866   : > { %v1721_v40 = vmul.f32 %v2440_v37, %v1713_v26 }
0x1868   : > { %v1726_v42 = vmul.f32 %v1724_v38, %v1721_v40 }
0x186a   : > { %v1730_v43 = vadd.f32 %v1728_v41, %v1726_v42 }
0x186c   : > { %2288 = vmatmul.mubr.msk.f32.vlgmr.msra.gmra.mrb[26].mxu1 %vm378_vm4, %v1730_v43 }
0x186d   : > { %2298 = vmatprep.mubr.msk.f32.mxu1 %vm2549_vm0, %v2548_v2  ;;  %2327 = vmatpush3.bf16.msra.mxu1 %v2326_v46 }
0x186e   : > { %2328 = vmatprep.subr.bf16.mxu1 %v2547_v1 }
0x1871   : > { %2330 = vmatpush3.bf16.msra.mxu1 %v2329_v49 }
0x193f   : > { %v1813_v52 = vpop.f32.mrb[26].mxu1 }
0x1940   : > { %v1814_v50 = vadd.f32 %v1813_v52, %v1742_v51  ;;  %v2289_v53 = vpop.f32.mrb[27].mxu1 }
0x1942   : > { %2441 = vtanh.f32 %v1814_v50 }
0x194c   : > { %v2442_v54 = vpop.eup %2441 }
0x194d   : > { %2299 = vmatmul.mubr.msk.f32.vlgmr.msra.gmra.mrb[32].mxu1 %vm378_vm4, %v2442_v54 }
0x1a20   : > { %v1887_v2 = vpop.f32.mrb[32].mxu1 }
0x1a21   : > { %v1888_v56 = vadd.f32 %v1887_v2, %v1739_v55  ;;  %v2300_v57 = vpop.f32.mrb[33].mxu1 }
0x1a23   : > { %v1892_v58 = vsel %vm1891_vm8, %v1888_v56, -inf }
0x1a24   : > { %1893 = vmax.xlane.f32.xlu0 %v1892_v58 }
0x1ab1   : > { %v1894_v59 = vpop.xlane.xlu0 %1893 }
0x1ab2   : > { %v1895_v1 = vsub.f32 %v1888_v56, %v1894_v59 }
0x1ab4   : > { %v1896_v60 = vmul.f32 1.442695, %v1895_v1 }
0x1ab6   : > { %2443 = vpow2.f32 %v1896_v60 }
0x1ac0   : > { %v2444_v62 = vpop.eup %2443 }
0x1ac1   : > { %v1898_v63 = vsel %vm1891_vm8, %v2444_v62, 0.0 }
0x1ac2   : > { %1899 = vadd.xlane.f32.xlu1 %v1898_v63 }
0x1b4f   : > { %v1900_v0 = vpop.xlane.xlu1 %1899 }
0x1b50   : > { %2445 = vrcp.f32 %v1900_v0 }
0x1b5a   : > { %v2446_v3 = vpop.eup %2445 }
0x1b5b   : > { %v1902_v4 = vmul.f32 %v2446_v3, %v2444_v62 }
0x1b5d   : > { %1903 = vst [vmem:[%s267_s11] sm:$0x1] %v1902_v4 }
0x1b5e   : > { %2488 = shalt.err (!%p2485_p7)
}
0x1b5f   : > { %s2489_s26 = scalar_lea.hbm %s2990_s15, 16  ;;  %s2493_s9 = scalar_lea.hbm %s3038_s6, 32 }
0x1b60   : > { %p2490_p8 = scmp.ne.s32.totalorder %s2990_s15, %s2489_s26  ;;  %p2494_p1 = scmp.lt.u32.totalorder %s2990_s15, %s3038_s6 }
0x1b61   : > { %p2495_p0 = scmp.lt.u32.totalorder %s2493_s9, %s2489_s26  ;;  %p2497_p6 = scmp.lt.u32.totalorder %s2489_s26, %s2990_s15 }
0x1b62   : > { %p2491_p11 = pnand %p2490_p8, %p3049_p9 }
0x1b63   : > { %p2496_p5 = por %p2495_p0, %p2494_p1 }
0x1b64   : > { %p2492_p13 = pneg %p2491_p11 }
0x1b65   : > { %p2498_p10 = por %p2497_p6, %p2496_p5 }
0x1b67   : > { %p2499_p12 = pnand %p2498_p10, %p2492_p13 }
0x1b69   : > { %2502 = shalt.err (!%p2499_p12)
}
0x1b6a   : > { %2335 = dma.vmem_to_hbm [thread:$0]  (%p3049_p9), %s2992_s14, 16, %s2990_s15, %s1905_s16  }
0x1b6b PF: > { %p2347_p2 = scmp.ge.s32.totalorder %s2541_s24, 2  ;;  %s1929_s11 = sand.u32 1, %s2529_s21  }
0x1b6c   : > { %p3050_p3 = scmp.ne.s32.totalorder %s3043_s8, 0  ;;  %s1930_s28 = scalar_lea.sflag [#allocation4], %s1929_s11 }
0x1b6e   : > { %p2342_p4 = pnand %p2347_p2, %p3050_p3 }
0x1b70   : > { %2524 = dma.done.wait (!%p2342_p4), %s1930_s28, 16  }
0x1b71   : > { %2526 = vsyncadd (!%p2342_p4), %s1930_s28, 4294967280  ;;  %p17_p7 = scmp.ge.s32.totalorder %s2618_s27, 4   ;;  %s3051_s21 = smov %s2533_s22 }
0x1b72   : > { %s3052_s22 = smov %s2537_s23  ;;  %s3053_s23 = smov %s2629_s30 }
0x1b73   : > { %s3054_s24 = smov %s2618_s27  ;;  %19 = sbr.rel (!%p17_p7) target bundleno = 4 (0x4), region = 89 }
0x1b7a   :  { %1934 = vsyncpa [#allocation3], 1 }
0x1b7b   :  { %1936 = vsyncpa [#allocation3 + $0x1], 1 }
0x1b7c   :  { %1937 = vsyncpa [#allocation4], 1 }
0x1b7d   :  { %1939 = vsyncpa [#allocation4 + $0x1], 1 }

</bundles_post_ra>
